<compile_context>
chip_gen: v6e
topology: v6e:2x2x1
jax: 0.10.0
libtpu: 0.0.40
codegen_flags: <defaults>
</compile_context>

<pallas_src>
import functools

import jax
import jax.numpy as jnp
from jax.experimental import pallas as pl
from jax.experimental.pallas import tpu as pltpu

LANE = 128
SUBLANE = 8
MAX_NODE_CHUNK = 512        # cap on the contraction chunk (keeps adj blocks small)


def _round_up(v, m):
    return (v + m - 1) // m * m


def _vmem_capacity_bytes():
    """Physical VMEM per core; conservative default if the query is unavailable."""
    try:
        return int(pltpu.get_tpu_info().vmem_capacity_bytes)
    except Exception:  # pure hardware query -> safe, conservative (v7x) default
        return 64 * 1024 * 1024


def _gin_kernel(scale_ref, x_ref, adj_ref, w1_ref, b1_ref, w2_ref, b2_ref,
                o_ref, acc_ref, *, block_b, n_pad, d_pad, chunk):
    """One (batch-block, node-chunk) grid step.

    scale_ref: SMEM (1,) f32                 (= 1 + eps, hoisted in the wrapper)
    x_ref:     VMEM (block_b*Np, Dp)         batch-major flat x block (native dtype)
    adj_ref:   VMEM (Np, chunk)              adjacency columns of this node chunk
    w1_ref:    VMEM (Dp, Hp),  b1_ref: (1, Hp)
    w2_ref:    VMEM (Hp, Dp),  b2_ref: (1, Dp)
    o_ref:     VMEM (block_b*Np, Dp)         output block (same layout as x)
    acc_ref:   VMEM (Np, block_b*Dp) f32     aggregation accumulator (node-major slab)
    """
    k = pl.program_id(1)

    @pl.when(k == 0)
    def _init():
        acc_ref[...] = jnp.zeros_like(acc_ref)

    # Node-major slab chunk (chunk, block_b*Dp): per-graph whole-(8,128)-tile
    # slices of the flat x block placed side by side along lanes.
    # TODO(synk): switch these slab<->flat shuffles to a single XLU transpose
    # (pltpu.einshape) once rank-3 major/sublane transposes are guaranteed to
    # lower; the concat form moves whole tiles and is known-good.
    slab_chunk = jnp.concatenate(
        [x_ref[pl.ds(pl.multiple_of(b * n_pad + k * chunk, SUBLANE), chunk), :]
         for b in range(block_b)],
        axis=1)

    # Aggregation for the whole batch block and this node chunk as ONE
    # lane-dense MXU matmul (native operand dtype, f32 accumulation).
    acc_ref[...] += jnp.dot(adj_ref[...], slab_chunk,
                            preferred_element_type=jnp.float32)

    @pl.when(k == pl.num_programs(1) - 1)
    def _finalize():
        x_flat = x_ref[...]                                   # (bb*Np, Dp)
        neighs = acc_ref[...]                                 # (Np, bb*Dp) f32
        # slab -> batch-major flat: whole-lane-tile slices + sublane concat.
        neighs_flat = jnp.concatenate(
            [neighs[:, b * d_pad:(b + 1) * d_pad] for b in range(block_b)],
            axis=0)                                           # (bb*Np, Dp) f32

        # (1 + eps) * x + neighs  -- f32 epilogue, scalar from SMEM.
        h = scale_ref[0] * x_flat.astype(jnp.float32) + neighs_flat

        # MLP: Linear -> ReLU -> Linear.  Operands feed the MXU in the weights'
        # dtype (bf16 stays bf16); accumulation / epilogue stay in f32.
        z1 = jnp.dot(h.astype(w1_ref.dtype), w1_ref[...],
                     preferred_element_type=jnp.float32) + b1_ref[...]
        z1 = jnp.maximum(z1, 0.0)
        z2 = jnp.dot(z1.astype(w2_ref.dtype), w2_ref[...],
                     preferred_element_type=jnp.float32) + b2_ref[...]

        # Residual add + lane-dense (Dp multiple of 128) unmasked store.
        o_ref[...] = (z2 + x_flat.astype(jnp.float32)).astype(o_ref.dtype)


def _pick_block_b(batch, n_pad, d_pad, h_pad, chunk, itemsize, budget_bytes):
    """Largest batch block that fits the VMEM budget, keeping >= 2 grid steps."""
    def vmem_need(bb):
        x_blk = 2 * bb * n_pad * d_pad * itemsize           # double-buffered
        o_blk = 2 * bb * n_pad * d_pad * itemsize
        adj_blk = 2 * n_pad * chunk * itemsize
        w_blk = 2 * (d_pad * h_pad + h_pad + h_pad * d_pad + d_pad) * itemsize
        acc = n_pad * bb * d_pad * 4
        tmps = 6 * bb * n_pad * max(d_pad, h_pad) * 4       # slab/h/z1/z2/casts
        return x_blk + o_blk + adj_blk + w_blk + acc + tmps

    divisors = [d for d in range(1, batch + 1) if batch % d == 0]
    fitting = [d for d in divisors if vmem_need(d) <= budget_bytes] or [1]
    # >= 2 steps on the batch axis: lets v7x shard it over both TensorCores and
    # pipelines the x / output DMAs across steps.
    multi = [d for d in fitting if batch // d >= 2]
    return max(multi) if multi else max(fitting)


def _build_call(batch, n_pad, d_pad, h_pad, block_b, chunk, out_dtype,
                vmem_limit_bytes):
    n_blocks = batch // block_b
    nk = n_pad // chunk
    m_blk = block_b * n_pad

    kernel = functools.partial(_gin_kernel, block_b=block_b, n_pad=n_pad,
                               d_pad=d_pad, chunk=chunk)

    return pl.pallas_call(
        kernel,
        out_shape=jax.ShapeDtypeStruct((batch * n_pad, d_pad), out_dtype),
        grid=(n_blocks, nk),
        in_specs=[
            pl.BlockSpec(memory_space=pltpu.MemorySpace.SMEM),          # scale
            pl.BlockSpec((m_blk, d_pad), lambda i, k: (i, 0)),          # x (flat)
            pl.BlockSpec((n_pad, chunk), lambda i, k: (0, k)),          # adj cols
            pl.BlockSpec((d_pad, h_pad), lambda i, k: (0, 0)),          # w1
            pl.BlockSpec((1, h_pad), lambda i, k: (0, 0)),              # b1
            pl.BlockSpec((h_pad, d_pad), lambda i, k: (0, 0)),          # w2
            pl.BlockSpec((1, d_pad), lambda i, k: (0, 0)),              # b2
        ],
        out_specs=pl.BlockSpec((m_blk, d_pad), lambda i, k: (i, 0)),
        scratch_shapes=[pltpu.VMEM((n_pad, block_b * d_pad), jnp.float32)],
        compiler_params=pltpu.CompilerParams(
            # batch-block axis carries no cross-step state -> "parallel";
            # node-chunk contraction axis is last and "arbitrary".
            dimension_semantics=("parallel", "arbitrary"),
            vmem_limit_bytes=vmem_limit_bytes,
        ),
    )


def gin_layer(x, adj, eps, w1, b1, w2, b2, *, block_b=None, node_chunk=None):
    """GIN layer forward: out = MLP((1+eps)*x + adj@x) + x.

    x: (B, N, D); adj: (N, N); w1: (D, H); b1: (H,); w2: (H, D); b2: (D,)
    """
    B, N, D = x.shape
    H = w1.shape[1]
    assert adj.shape == (N, N)
    assert w1.shape == (D, H) and w2.shape == (H, D)
    assert b1.shape == (H,) and b2.shape == (D,)

    d_pad = _round_up(D, LANE)
    h_pad = _round_up(H, LANE)

    # Node padding / contraction chunking.  Small graphs: one chunk (= full N).
    # Large graphs: stream adj in (Np, chunk) column blocks along a reduction
    # grid axis so the full (N, N) adjacency is never VMEM-resident.
    if node_chunk is None:
        if N <= MAX_NODE_CHUNK:
            n_pad = _round_up(N, SUBLANE)
            node_chunk = n_pad
        else:
            n_pad = _round_up(N, MAX_NODE_CHUNK)
            node_chunk = MAX_NODE_CHUNK
    else:
        n_pad = _round_up(N, node_chunk)
        assert node_chunk % SUBLANE == 0
        assert node_chunk == n_pad or node_chunk % LANE == 0, (
            "node_chunk must equal padded N or be a multiple of 128")
    assert n_pad % node_chunk == 0

    itemsize = jnp.dtype(x.dtype).itemsize
    vmem_cap = _vmem_capacity_bytes()
    vmem_limit = min(int(0.75 * vmem_cap), 128 * 1024 * 1024)
    if block_b is None:
        block_b = _pick_block_b(B, n_pad, d_pad, h_pad, node_chunk, itemsize,
                                budget_bytes=int(0.6 * vmem_cap))
    assert B % block_b == 0, "batch must be divisible by block_b"

    # Hoisted scalar epilogue constant (1 + eps), delivered through SMEM.
    scale = jnp.asarray(1.0 + eps, jnp.float32).reshape((1,))

    # Zero-pad features / hidden / nodes (mathematically exact: padded x rows
    # and adj rows/cols are zero, ReLU(0)=0, padded weight rows/cols are zero;
    # padded node rows only ever hold garbage and are sliced off below).
    # NOTE: in a multi-layer GIN network this pad and the final unpad run ONCE
    # at network entry/exit -- the kernel's input and output share the same
    # padded batch-major flat layout, so layers chain with no HBM relayout and
    # NO transpose pass per layer.
    xp = jnp.pad(x, ((0, 0), (0, n_pad - N), (0, d_pad - D)))
    x_flat = xp.reshape(B * n_pad, d_pad)                   # layout-preserving
    # 0/1 adjacency: casting to x.dtype is exact (bf16 path keeps the MXU in bf16).
    adj_p = jnp.pad(adj, ((0, n_pad - N), (0, n_pad - N))).astype(x.dtype)
    w1p = jnp.pad(w1, ((0, d_pad - D), (0, h_pad - H)))
    b1p = jnp.pad(b1, ((0, h_pad - H),)).reshape(1, h_pad)
    w2p = jnp.pad(w2, ((0, h_pad - H), (0, d_pad - D)))
    b2p = jnp.pad(b2, ((0, d_pad - D),)).reshape(1, d_pad)

    call = _build_call(B, n_pad, d_pad, h_pad, block_b, node_chunk, x.dtype,
                       vmem_limit)
    out_flat = call(scale, x_flat, adj_p, w1p, b1p, w2p, b2p)

    # (B*Np, Dp) batch-major flat -> (B, N, D)
    return out_flat.reshape(B, n_pad, d_pad)[:, :N, :D]


def gin_layer_ref(x, adj, eps, w1, b1, w2, b2):
    # pure-JAX reference mirroring the PyTorch forward
    neighs = jnp.einsum('nm,bmd->bnd', adj, x)
    res = (1.0 + eps) * x + neighs
    res = jnp.maximum(res @ w1 + b1, 0.0) @ w2 + b2
    return res + x


if __name__ == "__main__":
    # Small but non-trivial: N=256 with node_chunk=128 exercises the tiled
    # contraction + accumulator path (2 chunks); B=4 with auto block_b=2
    # exercises the multi-step "parallel" batch axis.
    B, N, D, H = 4, 256, 16, 32

    key = jax.random.PRNGKey(0)
    kx, ka, k1, k2, k3, k4 = jax.random.split(key, 6)

    x = jax.random.normal(kx, (B, N, D), dtype=jnp.float32)

    # deterministic symmetric 0/1 adjacency with self-loops
    a = (jax.random.uniform(ka, (N, N)) > 0.9).astype(jnp.float32)
    adj = jnp.clip(a + a.T + jnp.eye(N, dtype=jnp.float32), 0.0, 1.0)

    # MLP params (PyTorch Linear-style uniform init, deterministic)
    lim1 = 1.0 / (D ** 0.5)
    lim2 = 1.0 / (H ** 0.5)
    w1 = jax.random.uniform(k1, (D, H), minval=-lim1, maxval=lim1, dtype=jnp.float32)
    b1 = jax.random.uniform(k2, (H,), minval=-lim1, maxval=lim1, dtype=jnp.float32)
    w2 = jax.random.uniform(k3, (H, D), minval=-lim2, maxval=lim2, dtype=jnp.float32)
    b2 = jax.random.uniform(k4, (D,), minval=-lim2, maxval=lim2, dtype=jnp.float32)

    eps = 0.0  # initial_eps; trainable scalar parameter, deterministic at init

    out = gin_layer(x, adj, eps, w1, b1, w2, b2, node_chunk=128)
    out = jax.block_until_ready(out)

    ref = gin_layer_ref(x, adj, eps, w1, b1, w2, b2)
    assert out.shape == (B, N, D)
    assert jnp.allclose(out, ref, atol=1e-3, rtol=1e-3), "mismatch vs reference"

    print("KERNEL_OK")
</pallas_src>

<mosaic_0001>
module attributes {stable_mosaic.version = 11 : i64} {
  func.func @_gin_kernel(%arg0: i32, %arg1: i32, %arg2: memref<1xf32, #tpu.memory_space<smem>>, %arg3: memref<512x128xf32, #tpu.memory_space<vmem>>, %arg4: memref<256x128xf32, #tpu.memory_space<vmem>>, %arg5: memref<128x128xf32, #tpu.memory_space<vmem>>, %arg6: memref<1x128xf32, #tpu.memory_space<vmem>>, %arg7: memref<128x128xf32, #tpu.memory_space<vmem>>, %arg8: memref<1x128xf32, #tpu.memory_space<vmem>>, %arg9: memref<512x128xf32, #tpu.memory_space<vmem>>, %arg10: memref<256x256xf32, #tpu.memory_space<vmem>>) attributes {dimension_semantics = [#tpu.dimension_semantics<parallel>, #tpu.dimension_semantics<arbitrary>], iteration_bounds = array<i64: 2, 2>, scalar_prefetch = 0 : i64, scratch_operands = 1 : i64, tpu.core_type = #tpu.core_type<tc>, window_params = [{transform_indices = @transform_0, window_bounds = array<i64: 1>}, {transform_indices = @transform_1, window_bounds = array<i64: 512, 128>}, {transform_indices = @transform_2, window_bounds = array<i64: 256, 128>}, {pipeline_mode = #tpu.pipeline_mode<synchronous>, transform_indices = @transform_3, window_bounds = array<i64: 128, 128>}, {pipeline_mode = #tpu.pipeline_mode<synchronous>, transform_indices = @transform_4, window_bounds = array<i64: 1, 128>}, {pipeline_mode = #tpu.pipeline_mode<synchronous>, transform_indices = @transform_5, window_bounds = array<i64: 128, 128>}, {pipeline_mode = #tpu.pipeline_mode<synchronous>, transform_indices = @transform_6, window_bounds = array<i64: 1, 128>}, {transform_indices = @transform_7, window_bounds = array<i64: 512, 128>}]} {
    %c0_i32 = arith.constant 0 : i32
    %0 = arith.cmpi eq, %arg1, %c0_i32 : i32
    %1 = arith.extui %0 : i1 to i32
    %c0_i32_0 = arith.constant 0 : i32
    %2 = arith.cmpi ne, %1, %c0_i32_0 : i32
    scf.if %2 {
      %cst_11 = arith.constant 0.000000e+00 : f32
      %22 = vector.broadcast %cst_11 : f32 to vector<256x256xf32>
      %c0_12 = arith.constant 0 : index
      %c0_13 = arith.constant 0 : index
      %23 = vector.load %arg10[%c0_12, %c0_13] : memref<256x256xf32, #tpu.memory_space<vmem>>, vector<256x256xf32>
      tpu.vector_store %arg10[%c0_12, %c0_13], %22 {strides = array<i32>} : memref<256x256xf32, #tpu.memory_space<vmem>>, vector<256x256xf32>,
    } else {
    }
    %c128_i32 = arith.constant 128 : i32
    %3 = arith.muli %arg1, %c128_i32 : i32
    %c0_i32_1 = arith.constant 0 : i32
    %4 = arith.addi %c0_i32_1, %3 : i32
    %5 = tpu.assume_multiple %4, 8 : i32
    %6 = arith.index_cast %5 : i32 to index
    %c0 = arith.constant 0 : index
    %7 = vector.load %arg3[%6, %c0] : memref<512x128xf32, #tpu.memory_space<vmem>>, vector<128x128xf32>
    %c128_i32_2 = arith.constant 128 : i32
    %8 = arith.muli %arg1, %c128_i32_2 : i32
    %c256_i32 = arith.constant 256 : i32
    %9 = arith.addi %c256_i32, %8 : i32
    %10 = tpu.assume_multiple %9, 8 : i32
    %11 = arith.index_cast %10 : i32 to index
    %c0_3 = arith.constant 0 : index
    %12 = vector.load %arg3[%11, %c0_3] : memref<512x128xf32, #tpu.memory_space<vmem>>, vector<128x128xf32>
    %13 = tpu.concatenate %7, %12 in 1 : vector<128x128xf32>, vector<128x128xf32> -> vector<128x256xf32>
    %c0_4 = arith.constant 0 : index
    %c0_5 = arith.constant 0 : index
    %14 = vector.load %arg10[%c0_4, %c0_5] : memref<256x256xf32, #tpu.memory_space<vmem>>, vector<256x256xf32>
    %c0_6 = arith.constant 0 : index
    %c0_7 = arith.constant 0 : index
    %15 = vector.load %arg4[%c0_6, %c0_7] : memref<256x128xf32, #tpu.memory_space<vmem>>, vector<256x128xf32>
    %cst = arith.constant dense<0.000000e+00> : vector<256x256xf32>
    %16 = tpu.matmul %15, %13, %cst {dimension_numbers = #tpu.dot_dimension_numbers<[1], [0], [0], [1], [0, 0, 1, 1], [], []>} : vector<256x128xf32>, vector<128x256xf32>, vector<256x256xf32> -> vector<256x256xf32>
    %17 = arith.addf %14, %16 : vector<256x256xf32>
    %c0_8 = arith.constant 0 : index
    %c0_9 = arith.constant 0 : index
    %18 = vector.load %arg10[%c0_8, %c0_9] : memref<256x256xf32, #tpu.memory_space<vmem>>, vector<256x256xf32>
    tpu.vector_store %arg10[%c0_8, %c0_9], %17 {strides = array<i32>} : memref<256x256xf32, #tpu.memory_space<vmem>>, vector<256x256xf32>,
    %c1_i32 = arith.constant 1 : i32
    %19 = arith.cmpi eq, %arg1, %c1_i32 : i32
    %20 = arith.extui %19 : i1 to i32
    %c0_i32_10 = arith.constant 0 : i32
    %21 = arith.cmpi ne, %20, %c0_i32_10 : i32
    scf.if %21 {
      %c0_11 = arith.constant 0 : index
      %c0_12 = arith.constant 0 : index
      %22 = vector.load %arg3[%c0_11, %c0_12] : memref<512x128xf32, #tpu.memory_space<vmem>>, vector<512x128xf32>
      %c0_13 = arith.constant 0 : index
      %c0_14 = arith.constant 0 : index
      %23 = vector.load %arg10[%c0_13, %c0_14] : memref<256x256xf32, #tpu.memory_space<vmem>>, vector<256x256xf32>
      %24 = vector.extract_strided_slice %23 {offsets = [0, 0], sizes = [256, 128], strides = [1, 1]} : vector<256x256xf32> to vector<256x128xf32>
      %25 = vector.extract_strided_slice %23 {offsets = [0, 128], sizes = [256, 128], strides = [1, 1]} : vector<256x256xf32> to vector<256x128xf32>
      %26 = tpu.concatenate %24, %25 in 0 : vector<256x128xf32>, vector<256x128xf32> -> vector<512x128xf32>
      %c0_15 = arith.constant 0 : index
      %27 = memref.load %arg2[%c0_15] : memref<1xf32, #tpu.memory_space<smem>>
      %28 = vector.broadcast %27 : f32 to vector<512x128xf32>
      %29 = arith.mulf %28, %22 : vector<512x128xf32>
      %30 = arith.addf %29, %26 : vector<512x128xf32>
      %c0_16 = arith.constant 0 : index
      %c0_17 = arith.constant 0 : index
      %31 = vector.load %arg5[%c0_16, %c0_17] : memref<128x128xf32, #tpu.memory_space<vmem>>, vector<128x128xf32>
      %cst_18 = arith.constant dense<0.000000e+00> : vector<512x128xf32>
      %32 = tpu.matmul %30, %31, %cst_18 {dimension_numbers = #tpu.dot_dimension_numbers<[1], [0], [0], [1], [0, 0, 1, 1], [], []>} : vector<512x128xf32>, vector<128x128xf32>, vector<512x128xf32> -> vector<512x128xf32>
      %c0_19 = arith.constant 0 : index
      %c0_20 = arith.constant 0 : index
      %33 = vector.load %arg6[%c0_19, %c0_20] : memref<1x128xf32, #tpu.memory_space<vmem>>, vector<1x128xf32>
      %34 = vector.broadcast %33 : vector<1x128xf32> to vector<512x128xf32>
      %35 = arith.addf %32, %34 : vector<512x128xf32>
      %cst_21 = arith.constant 0.000000e+00 : f32
      %36 = vector.broadcast %cst_21 : f32 to vector<512x128xf32>
      %37 = arith.maximumf %35, %36 : vector<512x128xf32>
      %c0_22 = arith.constant 0 : index
      %c0_23 = arith.constant 0 : index
      %38 = vector.load %arg7[%c0_22, %c0_23] : memref<128x128xf32, #tpu.memory_space<vmem>>, vector<128x128xf32>
      %cst_24 = arith.constant dense<0.000000e+00> : vector<512x128xf32>
      %39 = tpu.matmul %37, %38, %cst_24 {dimension_numbers = #tpu.dot_dimension_numbers<[1], [0], [0], [1], [0, 0, 1, 1], [], []>} : vector<512x128xf32>, vector<128x128xf32>, vector<512x128xf32> -> vector<512x128xf32>
      %c0_25 = arith.constant 0 : index
      %c0_26 = arith.constant 0 : index
      %40 = vector.load %arg8[%c0_25, %c0_26] : memref<1x128xf32, #tpu.memory_space<vmem>>, vector<1x128xf32>
      %41 = vector.broadcast %40 : vector<1x128xf32> to vector<512x128xf32>
      %42 = arith.addf %39, %41 : vector<512x128xf32>
      %43 = arith.addf %42, %22 : vector<512x128xf32>
      %c0_27 = arith.constant 0 : index
      %c0_28 = arith.constant 0 : index
      %44 = vector.load %arg9[%c0_27, %c0_28] : memref<512x128xf32, #tpu.memory_space<vmem>>, vector<512x128xf32>
      tpu.vector_store %arg9[%c0_27, %c0_28], %43 {strides = array<i32>} : memref<512x128xf32, #tpu.memory_space<vmem>>, vector<512x128xf32>,
    } else {
    }
    return
  }
  func.func @transform_0(%arg0: i32, %arg1: i32) -> i32 {
    %c0_i32 = arith.constant 0 : i32
    %c0_i32_0 = arith.constant 0 : i32
    return %c0_i32 : i32
  }
  func.func @transform_1(%arg0: i32, %arg1: i32) -> (i32, i32) {
    %c0_i32 = arith.constant 0 : i32
    %c0_i32_0 = arith.constant 0 : i32
    return %arg0, %c0_i32 : i32, i32
  }
  func.func @transform_2(%arg0: i32, %arg1: i32) -> (i32, i32) {
    %c0_i32 = arith.constant 0 : i32
    %c0_i32_0 = arith.constant 0 : i32
    return %c0_i32, %arg1 : i32, i32
  }
  func.func @transform_3(%arg0: i32, %arg1: i32) -> (i32, i32) {
    %c0_i32 = arith.constant 0 : i32
    %c0_i32_0 = arith.constant 0 : i32
    %c0_i32_1 = arith.constant 0 : i32
    return %c0_i32, %c0_i32_0 : i32, i32
  }
  func.func @transform_4(%arg0: i32, %arg1: i32) -> (i32, i32) {
    %c0_i32 = arith.constant 0 : i32
    %c0_i32_0 = arith.constant 0 : i32
    %c0_i32_1 = arith.constant 0 : i32
    return %c0_i32, %c0_i32_0 : i32, i32
  }
  func.func @transform_5(%arg0: i32, %arg1: i32) -> (i32, i32) {
    %c0_i32 = arith.constant 0 : i32
    %c0_i32_0 = arith.constant 0 : i32
    %c0_i32_1 = arith.constant 0 : i32
    return %c0_i32, %c0_i32_0 : i32, i32
  }
  func.func @transform_6(%arg0: i32, %arg1: i32) -> (i32, i32) {
    %c0_i32 = arith.constant 0 : i32
    %c0_i32_0 = arith.constant 0 : i32
    %c0_i32_1 = arith.constant 0 : i32
    return %c0_i32, %c0_i32_0 : i32, i32
  }
  func.func @transform_7(%arg0: i32, %arg1: i32) -> (i32, i32) {
    %c0_i32 = arith.constant 0 : i32
    %c0_i32_0 = arith.constant 0 : i32
    return %arg0, %c0_i32 : i32, i32
  }
}

</mosaic_0001>

<bundles_post_ra>
// kernel: tpu_custom_call.1
= control target key start
LH: loop header
LB: loop body
LE: loop exit
PB: predicated region body
PF: predicated region fallthrough
CT: control target
= control target key end

     0   :  { %s4228_s0 = inlined_call_operand.<no memory space> [shape: f32[1], index: 0, kind: input, shape index: {}]   ;;  %s4229_s1 = inlined_call_operand.hbm [shape: f32[1024,128], index: 1, kind: input, shape index: {}]   ;;  %s4230_s2 = inlined_call_operand.hbm [shape: f32[256,256], index: 2, kind: input, shape index: {}]   ;;  %s4231_s3 = inlined_call_operand.hbm [shape: f32[128,128], index: 3, kind: input, shape index: {}]   ;;  %s4232_s4 = inlined_call_operand.vmem [shape: f32[1,128], index: 4, kind: input, shape index: {}]   ;;  %s4233_s5 = inlined_call_operand.hbm [shape: f32[128,128], index: 5, kind: input, shape index: {}]   ;;  %s4234_s6 = inlined_call_operand.vmem [shape: f32[1,128], index: 6, kind: input, shape index: {}]   ;;  %s4235_s7 = inlined_call_operand.hbm [shape: f32[1024,128], index: 7, kind: output, shape index: {}]  }
   0x1   :  { %4252 = sst [smem:[#allocation27_spill]] %s4229_s1 }
   0x2   :  { %4253 = sst [smem:[#allocation28_spill]] %s4231_s3 }
   0x3   :  { %4254 = sst [smem:[#allocation29_spill]] %s4232_s4 }
   0x4   :  { %4255 = sst [smem:[#allocation30_spill]] %s4233_s5 }
   0x5   :  { %4256 = sst [smem:[#allocation31_spill]] %s4234_s6 }
   0x6   :  { %4257 = sst [smem:[#allocation32_spill]] %s4235_s7 }
   0x7   :  { %12 = sst [smem:[#allocation3]] %s4228_s0 }
   0x8   :  { %13 = vsyncpa [#allocation5], 0 }
   0x9   :  { %15 = vsyncpa [#allocation5 + $0x1], 0 }
   0xa   :  { %16 = vsyncpa [#allocation8], 0 }
   0xb   :  { %18 = vsyncpa [#allocation8 + $0x1], 0 }
   0xc   :  { %19 = vsyncpa [#allocation11], 0 }
   0xd   :  { %20 = vsyncpa [#allocation6], 0 }
   0xe   :  { %22 = vsyncpa [#allocation6 + $0x1], 0  ;;  %s3370_s26 = smov 0   ;;  %s3372_s27 = smov 0  }
   0xf   :  { %s3374_s28 = smov 0   ;;  %s3376_s29 = smov 0  }
  0x10   :  { %s3378_s30 = smov 0   ;;  %s3380_s8 = smov 0  }
  0x11   :  { %s3382_s0 = smov 0   ;;  %s3384_s9 = smov 0  }
  0x12   :  { %s3386_s10 = smov 0   ;;  %s3388_s11 = smov 0  }
  0x13   :  { %s3390_s12 = smov 0  }
  0x14 LB: > { %4258 = sst [smem:[#allocation18_spill]] %s3285_s29  ;;  %s3424_s13 = sadd.s32 4294967295, %s3313_s12   ;;  %s3313_s12 = sphi %s3390_s12, %s28_s12   ;;  %s3309_s11 = sphi %s3388_s11, %s4304_s11   ;;  %s3305_s10 = sphi %s3386_s10, %s4312_s10   ;;  %s3301_s9 = sphi %s3384_s9, %s4311_s9   ;;  %s3297_s0 = sphi %s3382_s0, %s4310_s0   ;;  %s3293_s8 = sphi %s3380_s8, %s4301_s8   ;;  %s3289_s30 = sphi %s3378_s30, %s4309_s30   ;;  %s3285_s29 = sphi %s3376_s29, %s4308_s29   ;;  %s3281_s28 = sphi %s3374_s28, %s4307_s28   ;;  %s3277_s27 = sphi %s3372_s27, %s4306_s27   ;;  %s3273_s26 = sphi %s3370_s26, %s4305_s26  }
  0x15   : > { %4259 = sst [smem:[#allocation19_spill]] %s3293_s8  ;;  %s2381_s14 = sadd.s32 4294967294, %s3313_s12  }
  0x16   : > { %4260 = sst [smem:[#allocation20_spill]] %s3301_s9  ;;  %p81_p0 = scmp.ne.s32.totalorder %s3289_s30, %s3285_s29 }
  0x17   : > { %4261 = sst [smem:[#allocation21_spill]] %s3309_s11  ;;  %p4237_p1 = scmp.eq.s32.totalorder %s3424_s13, 0 }
  0x18   : > { %p107_p4 = scmp.ne.s32.totalorder %s3277_s27, %s3273_s26  ;;  %p221_p6 = scmp.eq.s32.totalorder %s2381_s14, 3 }
  0x19   : > { %p3435_p3 = por %p4237_p1, %p81_p0  ;;  %p2382_p8 = scmp.ge.s32.totalorder %s3313_s12, 1 }
  0x1a   : > { %p3443_p7 = por %p107_p4, %p4237_p1  ;;  %p3448_p9 = por %p221_p6, %p81_p0 }
  0x1b   : > { %p228_p10 = scmp.lt.s32.totalorder %s3313_s12, 5  ;;  %s3315_s20 = smov [#allocation9]  }
  0x1c   : > { %s4263_s17 = scalar_select %p3443_p7, 1, 0 }
  0x1d   : > { %s4264_s18 = scalar_select %p3448_p9, 1, 0 }
  0x1e   : > { %p3453_p11 = pnand %p2382_p8, %p228_p10  ;;  %s243_s21 = sshll.u32 %s3315_s20, 4  ;;  %s244_s21 = int_to_ptr.vmem [resolvable:$true] %s243_s21 }
  0x1f   : > { %4265 = sst [smem:[#allocation22_spill]] %s4264_s18  ;;  %s3316_s23 = smov [#allocation10]  }
  0x20   : > { %p2888_p12 = pneg %p3453_p11  ;;  %s259_s24 = sshll.u32 %s3316_s23, 4  ;;  %s260_s24 = int_to_ptr.vmem [resolvable:$true] %s259_s24 }
  0x21   : > { %s3084_s25 = scalar_lea.vmem %s244_s21, 2048  ;;  %p3092_p10 = scmp.lt.s32.totalorder %s244_s21, %s244_s21 }
  0x22   : > { %p3461_p13 = pnand %p2888_p12, %p4237_p1  ;;  %p3085_p4 = scmp.ne.s32.totalorder %s244_s21, %s3084_s25 }
  0x23   : > { %p3093_p5 = scmp.lt.s32.totalorder %s3084_s25, %s3084_s25 }
  0x24   : > { %p3075_p0 = pneg %p3461_p13 }
  0x25   : > { %p3094_p2 = por %p3093_p5, %p3092_p10 }
  0x26   : > { %p3087_p6 = pnand %p3085_p4, %p3075_p0 }
  0x28   : > { %p3088_p8 = pneg %p3087_p6 }
  0x2a   : > { %p3095_p12 = pnand %p3094_p2, %p3088_p8 }
  0x2c   : > { %3098 = shalt.err (!%p3095_p12)
}
  0x2d   : > { %s4238_s26 = smov 128   ;;  %s4240_s14 = smov 8  }
  0x2e   : > { %s4268_s3 = sld [smem:[#allocation28_spill]]  ;;  %s3110_s15 = scalar_lea.vmem %s260_s24, 2048 }
  0x2f   : > { %p3111_p4 = scmp.ne.s32.totalorder %s260_s24, %s3110_s15  ;;  %p3118_p2 = scmp.lt.s32.totalorder %s260_s24, %s260_s24 }
  0x30   : > { %p3119_p8 = scmp.lt.s32.totalorder %s3110_s15, %s3110_s15 }
  0x31   : > { %p3113_p6 = pnand %p3111_p4, %p3075_p0 }
  0x32   : > { %p3120_p10 = por %p3119_p8, %p3118_p2 }
  0x33   : > { %p3114_p5 = pneg %p3113_p6 }
  0x34   : > { %2891 = dma.hbm_to_vmem [thread:$0]  (!%p3461_p13), %s4268_s3, 2048, %s244_s21, [#allocation8], %s4238_s26, %s4238_s26, %s4240_s14  }
  0x35   : > { %p3121_p12 = pnand %p3120_p10, %p3114_p5 }
  0x37   : > { %3124 = shalt.err (!%p3121_p12)
}
  0x38   : > { %s4269_s5 = sld [smem:[#allocation30_spill]]  ;;  %s37_s15 = sadd.s32 1, %s3305_s10 }
  0x39   : > { %s40_s21 = sadd.s32 1, %s3309_s11  ;;  %p38_p0 = scmp.ge.s32.totalorder %s37_s15, 2 }
  0x3a   : > { %s68_s18 = sadd.s32 1, %s3293_s8  ;;  %p75_p4 = scmp.ne.s32.totalorder %s3293_s8, %s3289_s30 }
  0x3b   : > { %p76_p6 = scmp.eq.s32.totalorder %s3313_s12, 0  ;;  %s4314_s15 = smov (%p38_p0, %s37_s15), 0 }
  0x3c   : > { %4270 = sst [smem:[#allocation23_spill]] %s4314_s15  ;;  %s4316_s21 = smov (!%p38_p0, %s40_s21), %s3309_s11 }
  0x3d   : > { %p3498_p5 = por %p76_p6, %p75_p4  ;;  %p4272_p8 = scmp.ne.s32.totalorder %s3281_s28, %s3277_s27 }
  0x3e   : > { %2894 = dma.hbm_to_vmem [thread:$0]  (!%p3461_p13), %s4269_s5, 2048, %s260_s24, [#allocation11], %s4238_s26, %s4238_s26, %s4240_s14  }
  0x3f   : > { %s91_s24 = ssub.s32 %s3305_s10, %s4314_s15  ;;  %p42_p13 = scmp.ge.s32.totalorder %s4316_s21, 2 }
  0x40   : > { %p92_p2 = scmp.eq.s32.totalorder %s91_s24, 0  ;;  %p3507_p10 = por %p4272_p8, %p76_p6 }
  0x41   : > { %p4274_p12 = scmp.eq.s32.totalorder %s3424_s13, 3  ;;  %s4318_s21 = smov (%p42_p13, %s4316_s21), 0 }
  0x42   : > { %4277 = sst [smem:[#allocation25_spill]] %s4318_s21  ;;  %s4278_s25 = sadd.s32 1, %s3281_s28 }
  0x43   : > { %p3513_p1 = por %p4274_p12, %p75_p4  ;;  %s65_s24 = ssub.s32 %s3309_s11, %s4318_s21 }
  0x44   : > { %s3522_s26 = scalar_select %p92_p2, %s3281_s28, %s4278_s25  }
  0x45   : > { %s4275_s23 = scalar_select %p3513_p1, 1, 0 }
  0x46   : > { %p2908_p0 = scmp.lt.s32.totalorder %s3313_s12, 4  ;;  %p66_p9 = scmp.eq.s32.totalorder %s65_s24, 0 }
  0x47   : > { %4276 = sst [smem:[#allocation24_spill]] %s4275_s23  ;;  %s276_s14 = sand.u32 1, %s3293_s8  }
  0x48   : > { %s2386_s3 = sshll.u32 %s276_s14, 9  ;;  %s2424_s15 = sshll.u32 %s3309_s11, 13 }
  0x49   : > { %s3529_s5 = scalar_select %p66_p9, %s3293_s8, %s68_s18  }
  0x4a   : > { %s4280_s1 = sld [smem:[#allocation27_spill]]  ;;  %s280_s23 = scalar_lea.vmem [#allocation4], %s2386_s3 }
  0x4b   : > { %4279 = sst [smem:[#allocation26_spill]] %s3529_s5  ;;  %s287_s6 = sshll.u32 %s280_s23, 4  ;;  %s288_s6 = int_to_ptr.vmem [resolvable:$true] %s287_s6 }
  0x4c   : > { %p3537_p4 = pnand %p2908_p0, %p3498_p5  ;;  %p3543_p6 = pnand %p2908_p0, %p3507_p10 }
  0x4d   : > { %s297_s18 = sand.u32 1, %s3313_s12   ;;  %s277_s24 = scalar_lea.sflag [#allocation5], %s276_s14 }
  0x4e   : > { %p3127_p9 = pneg %p3537_p4  ;;  %s3138_s7 = scalar_lea.vmem %s288_s6, 8192 }
  0x4f   : > { %p3139_p13 = scmp.ne.s32.totalorder %s288_s6, %s3138_s7  ;;  %s3319_s3 = smov [#allocation4]  }
  0x50   : > { %s286_s9 = scalar_lea.hbm %s4280_s1, %s2424_s15  ;;  %s3143_s29 = sshll.u32 %s3319_s3, 4  ;;  %s3144_s29 = int_to_ptr.vmem [resolvable:$false] %s3143_s29 }
  0x51   : > { %p3141_p2 = pnand %p3139_p13, %p3127_p9  ;;  %s3145_s15 = scalar_lea.vmem %s3144_s29, 16384 }
  0x52   : > { %p3146_p5 = scmp.lt.s32.totalorder %s288_s6, %s3144_s29  ;;  %p3147_p12 = scmp.lt.s32.totalorder %s3145_s15, %s3138_s7 }
  0x53   : > { %p3142_p8 = pneg %p3141_p2 }
  0x54   : > { %p3148_p1 = por %p3147_p12, %p3146_p5 }
  0x56   : > { %p3149_p7 = pnand %p3148_p1, %p3142_p8 }
  0x58   : > { %3152 = shalt.err (!%p3149_p7)
}
  0x59   : > { %s4283_s22 = smov 8   ;;  %s4284_s20 = smov 128  }
  0x5a   : > { %2898 = dma.hbm_to_vmem [thread:$0]  (!%p3537_p4), %s286_s9, 8192, %s288_s6, %s277_s24, %s4284_s20, %s4284_s20, %s4283_s22  }
  0x5b   : > { %s299_s14 = sand.u32 1, %s3281_s28   ;;  %s2390_s1 = sshll.u32 %s3305_s10, 7 }
  0x5c   : > { %s2389_s23 = sshll.u32 %s299_s14, 8  ;;  %s306_s29 = scalar_lea.hbm %s4230_s2, %s2390_s1 }
  0x5d   : > { %s301_s7 = scalar_lea.vmem [#allocation7], %s2389_s23  ;;  %s298_s11 = scalar_lea.sflag [#allocation8], %s297_s18 }
  0x5e   : > { %s307_s15 = sshll.u32 %s301_s7, 4  ;;  %p3155_p1 = pneg %p3543_p6  ;;  %s308_s15 = int_to_ptr.vmem [resolvable:$true] %s307_s15 }
  0x5f   : > { %s3166_s4 = scalar_lea.vmem %s308_s15, 4096  ;;  %s3320_s5 = smov [#allocation7]  }
  0x60   : > { %p3167_p7 = scmp.ne.s32.totalorder %s308_s15, %s3166_s4  ;;  %s3171_s8 = sshll.u32 %s3320_s5, 4  ;;  %s3172_s8 = int_to_ptr.vmem [resolvable:$false] %s3171_s8 }
  0x61   : > { %s3173_s6 = scalar_lea.vmem %s3172_s8, 8192  ;;  %p3174_p4 = scmp.lt.s32.totalorder %s308_s15, %s3172_s8 }
  0x62   : > { %p3169_p10 = pnand %p3167_p7, %p3155_p1  ;;  %p3175_p9 = scmp.lt.s32.totalorder %s3173_s6, %s3166_s4 }
  0x64   : > { %p3170_p0 = pneg %p3169_p10  ;;  %p3176_p13 = por %p3175_p9, %p3174_p4 }
  0x66   : > { %p3177_p2 = pnand %p3176_p13, %p3170_p0 }
  0x68   : > { %3180 = shalt.err (!%p3177_p2)
}
  0x69   : > { %s3321_s1 = smov 256   ;;  %319 = sbr.rel (%p3453_p11) target bundleno = 1040 (0x410), region = 48 }
  0x6a   : > { %2901 = dma.hbm_to_vmem [thread:$0]  (!%p3543_p6), %s306_s29, 4096, %s308_s15, %s298_s11, %s3321_s1, %s4284_s20, %s4283_s22  }
  0x6b   : > { %s3569_s9 = sand.u32 (!%p3453_p11), 1, %s3289_s30  }
  0x6c   : > { %s2392_s5 = sshll.u32 (!%p3453_p11), %s3569_s9, 9  ;;  %s322_s8 = scalar_lea.sflag (!%p3453_p11), [#allocation5], %s3569_s9 }
  0x6d   : > { %s3573_s21 = scalar_lea.vmem (!%p3453_p11), [#allocation4], %s2392_s5 }
  0x6e   : > { %3252 = dma.done.wait (%p3435_p3), %s322_s8, 8192  }
  0x6f   : > { %3254 = vsyncadd (%p3435_p3), %s322_s8, 4294959104  ;;  %s330_s11 = sand.u32 1, %s3424_s13   ;;  %s332_s19 = sand.u32 1, %s3277_s27  }
  0x70   : > { %s2393_s25 = sshll.u32 %s332_s19, 8  ;;  %s331_s18 = scalar_lea.sflag [#allocation8], %s330_s11 }
  0x71   : > { %s3581_s24 = scalar_lea.vmem [#allocation7], %s2393_s25  ;;  %p4285_p11 = scmp.ne.s32.totalorder %s4263_s17, 0 }
  0x73   : > { %3256 = dma.done.wait (%p4285_p11), %s331_s18, 4096  }
  0x74   : > { %3258 = vsyncadd (%p4285_p11), %s331_s18, 4294963200  ;;  %p4286_p6 = scmp.eq.s32.totalorder %s3424_s13, 0 }
  0x76   : > { %3260 = dma.done.wait (%p4286_p6), [#allocation8], 2048   ;;  %p4287_p8 = pmov %p4286_p6 }
  0x77   : > { %p4288_p3 = pmov %p4286_p6 }
  0x78   : > { %3262 = vsyncadd (%p4287_p8), [#allocation8], 4294965248 }
  0x79   : > { %3264 = dma.done.wait (%p4288_p3), [#allocation11], 2048   ;;  %p4289_p5 = pmov %p4288_p3 }
  0x7a   : > { %s3595_s16 = scalar_lea.vmem [#allocation12], %s2392_s5  ;;  %p2397_p12 = scmp.ne.s32.totalorder %s3297_s0, 0 }
  0x7b   : > { %3266 = vsyncadd (%p4289_p5), [#allocation11], 4294965248 }
  0x7c   : > { %383 = sbr.rel (%p2397_p12) target bundleno = 162 (0xa2), region = 68 }
  0x81   : > { %v3322_v0 = vmov 0.0  }
  0x82   : > { %384 = vst [vmem:[#allocation2 + $0xb0] sm:$0xff] %v3322_v0  ;;  %385 = vst [vmem:[#allocation2 + $0x1b0] sm:$0xff] %v3322_v0 }
  0x83   : > { %386 = vst [vmem:[#allocation2 + $0xd8] sm:$0xff] %v3322_v0  ;;  %387 = vst [vmem:[#allocation2 + $0x18] sm:$0xff] %v3322_v0 }
  0x84   : > { %388 = vst [vmem:[#allocation2 + $0x50] sm:$0xff] %v3322_v0  ;;  %389 = vst [vmem:[#allocation2 + $0x168] sm:$0xff] %v3322_v0 }
  0x85   : > { %390 = vst [vmem:[#allocation2 + $0x130] sm:$0xff] %v3322_v0  ;;  %391 = vst [vmem:[#allocation2 + $0x48] sm:$0xff] %v3322_v0 }
  0x86   : > { %392 = vst [vmem:[#allocation2 + $0x180] sm:$0xff] %v3322_v0  ;;  %393 = vst [vmem:[#allocation2 + $0x110] sm:$0xff] %v3322_v0 }
  0x87   : > { %394 = vst [vmem:[#allocation2 + $0x118] sm:$0xff] %v3322_v0  ;;  %395 = vst [vmem:[#allocation2 + $0x98] sm:$0xff] %v3322_v0 }
  0x88   : > { %396 = vst [vmem:[#allocation2 + $0x120] sm:$0xff] %v3322_v0  ;;  %397 = vst [vmem:[#allocation2 + $0x150] sm:$0xff] %v3322_v0 }
  0x89   : > { %398 = vst [vmem:[#allocation2 + $0x108] sm:$0xff] %v3322_v0  ;;  %399 = vst [vmem:[#allocation2 + $0x60] sm:$0xff] %v3322_v0 }
  0x8a   : > { %400 = vst [vmem:[#allocation2 + $0xe0] sm:$0xff] %v3322_v0  ;;  %401 = vst [vmem:[#allocation2 + $0x188] sm:$0xff] %v3322_v0 }
  0x8b   : > { %402 = vst [vmem:[#allocation2 + $0x138] sm:$0xff] %v3322_v0  ;;  %403 = vst [vmem:[#allocation2 + $0x140] sm:$0xff] %v3322_v0 }
  0x8c   : > { %404 = vst [vmem:[#allocation2 + $0x80] sm:$0xff] %v3322_v0  ;;  %405 = vst [vmem:[#allocation2 + $0x1a8] sm:$0xff] %v3322_v0 }
  0x8d   : > { %406 = vst [vmem:[#allocation2 + $0x1b8] sm:$0xff] %v3322_v0  ;;  %407 = vst [vmem:[#allocation2 + $0x28] sm:$0xff] %v3322_v0 }
  0x8e   : > { %408 = vst [vmem:[#allocation2 + $0x1e8] sm:$0xff] %v3322_v0  ;;  %409 = vst [vmem:[#allocation2 + $0xf8] sm:$0xff] %v3322_v0 }
  0x8f   : > { %410 = vst [vmem:[#allocation2 + $0x160] sm:$0xff] %v3322_v0  ;;  %411 = vst [vmem:[#allocation2 + $0x30] sm:$0xff] %v3322_v0 }
  0x90   : > { %412 = vst [vmem:[#allocation2 + $0x1e0] sm:$0xff] %v3322_v0  ;;  %413 = vst [vmem:[#allocation2] sm:$0xff] %v3322_v0 }
  0x91   : > { %414 = vst [vmem:[#allocation2 + $0xf0] sm:$0xff] %v3322_v0  ;;  %415 = vst [vmem:[#allocation2 + $0x8] sm:$0xff] %v3322_v0 }
  0x92   : > { %416 = vst [vmem:[#allocation2 + $0x148] sm:$0xff] %v3322_v0  ;;  %417 = vst [vmem:[#allocation2 + $0x1d0] sm:$0xff] %v3322_v0 }
  0x93   : > { %418 = vst [vmem:[#allocation2 + $0x100] sm:$0xff] %v3322_v0  ;;  %419 = vst [vmem:[#allocation2 + $0xc8] sm:$0xff] %v3322_v0 }
  0x94   : > { %420 = vst [vmem:[#allocation2 + $0x40] sm:$0xff] %v3322_v0  ;;  %421 = vst [vmem:[#allocation2 + $0x1f8] sm:$0xff] %v3322_v0 }
  0x95   : > { %422 = vst [vmem:[#allocation2 + $0x20] sm:$0xff] %v3322_v0  ;;  %423 = vst [vmem:[#allocation2 + $0x128] sm:$0xff] %v3322_v0 }
  0x96   : > { %424 = vst [vmem:[#allocation2 + $0x1a0] sm:$0xff] %v3322_v0  ;;  %425 = vst [vmem:[#allocation2 + $0x1f0] sm:$0xff] %v3322_v0 }
  0x97   : > { %426 = vst [vmem:[#allocation2 + $0xe8] sm:$0xff] %v3322_v0  ;;  %427 = vst [vmem:[#allocation2 + $0x78] sm:$0xff] %v3322_v0 }
  0x98   : > { %428 = vst [vmem:[#allocation2 + $0x70] sm:$0xff] %v3322_v0  ;;  %429 = vst [vmem:[#allocation2 + $0x90] sm:$0xff] %v3322_v0 }
  0x99   : > { %430 = vst [vmem:[#allocation2 + $0x1d8] sm:$0xff] %v3322_v0  ;;  %431 = vst [vmem:[#allocation2 + $0xd0] sm:$0xff] %v3322_v0 }
  0x9a   : > { %432 = vst [vmem:[#allocation2 + $0xb8] sm:$0xff] %v3322_v0  ;;  %433 = vst [vmem:[#allocation2 + $0x88] sm:$0xff] %v3322_v0 }
  0x9b   : > { %434 = vst [vmem:[#allocation2 + $0xa8] sm:$0xff] %v3322_v0  ;;  %435 = vst [vmem:[#allocation2 + $0x1c8] sm:$0xff] %v3322_v0 }
  0x9c   : > { %436 = vst [vmem:[#allocation2 + $0x170] sm:$0xff] %v3322_v0  ;;  %437 = vst [vmem:[#allocation2 + $0x178] sm:$0xff] %v3322_v0 }
  0x9d   : > { %438 = vst [vmem:[#allocation2 + $0x68] sm:$0xff] %v3322_v0  ;;  %439 = vst [vmem:[#allocation2 + $0x190] sm:$0xff] %v3322_v0 }
  0x9e   : > { %440 = vst [vmem:[#allocation2 + $0x198] sm:$0xff] %v3322_v0  ;;  %441 = vst [vmem:[#allocation2 + $0x38] sm:$0xff] %v3322_v0 }
  0x9f   : > { %442 = vst [vmem:[#allocation2 + $0xc0] sm:$0xff] %v3322_v0  ;;  %443 = vst [vmem:[#allocation2 + $0x1c0] sm:$0xff] %v3322_v0 }
  0xa0   : > { %444 = vst [vmem:[#allocation2 + $0x158] sm:$0xff] %v3322_v0  ;;  %445 = vst [vmem:[#allocation2 + $0x10] sm:$0xff] %v3322_v0 }
  0xa1   : > { %446 = vst [vmem:[#allocation2 + $0x58] sm:$0xff] %v3322_v0  ;;  %447 = vst [vmem:[#allocation2 + $0xa0] sm:$0xff] %v3322_v0 }
  0xa2 PF: > { %s2398_s13 = sshll.u32 %s3297_s0, 7  ;;  %v3323_v1 = vmov 0.0   ;;  %v548_v34 = vld [vmem:[%s3581_s24] sm:$0xff]  ;;  %v549_v36 = vld [vmem:[%s3581_s24 + $0x8] sm:$0xff]  ;;  %v550_v38 = vld [vmem:[%s3581_s24 + $0x10] sm:$0xff]  ;;  %p2416_p1 = scmp.ne.s32.totalorder %s3297_s0, 1 }
  0xa3   : > { %s3664_s17 = scalar_lea.vmem %s3573_s21, %s2398_s13 [#allocation4]  ;;  %644 = vmatprep.mubr.f32.mxu0 %v3323_v1  ;;  %740 = vmatprep.mubr.f32.mxu1 %v3323_v1  ;;  %v564_v35 = vld [vmem:[%s3581_s24 + $0x80] sm:$0xff]  ;;  %v565_v37 = vld [vmem:[%s3581_s24 + $0x88] sm:$0xff]  ;;  %v566_v39 = vld [vmem:[%s3581_s24 + $0x90] sm:$0xff]  ;;  %s1097_s22 = sld [smem:[#allocation3]] (!%p2416_p1) }
  0xa4   : > { %v2415_v2 = vld [vmem:[%s3664_s17 + $0x178] sm:$0xff]  ;;  %v2414_v4 = vld [vmem:[%s3664_s17 + $0x170] sm:$0xff]  ;;  %v2413_v6 = vld [vmem:[%s3664_s17 + $0x168] sm:$0xff]  ;;  %s4290_s14 = sld [smem:[#allocation29_spill]] (!%p2416_p1) }
  0xa5   : > { %v465_v3 = vld [vmem:[%s3664_s17 + $0x78] sm:$0xff]  ;;  %580 = vmatprep.subr.mxu0 %v2415_v2  ;;  %2842 = vmatprep.subr.mxu1 %v2415_v2  ;;  %v464_v5 = vld [vmem:[%s3664_s17 + $0x70] sm:$0xff]  ;;  %v463_v7 = vld [vmem:[%s3664_s17 + $0x68] sm:$0xff]  ;;  %s4291_s29 = sld [smem:[#allocation31_spill]] (!%p2416_p1) }
  0xa6   : > { %581 = vmatpush1.msra.mxu0 %v465_v3  ;;  %2858 = vmatpush1.msra.mxu1 %v465_v3  ;;  %v2412_v8 = vld [vmem:[%s3664_s17 + $0x160] sm:$0xff]  ;;  %v2411_v10 = vld [vmem:[%s3664_s17 + $0x158] sm:$0xff]  ;;  %v2410_v12 = vld [vmem:[%s3664_s17 + $0x150] sm:$0xff] }
  0xa7   : > { %582 = vmatprep.subr.mxu0 %v2414_v4  ;;  %2843 = vmatprep.subr.mxu1 %v2414_v4  ;;  %v462_v9 = vld [vmem:[%s3664_s17 + $0x60] sm:$0xff]  ;;  %v461_v11 = vld [vmem:[%s3664_s17 + $0x58] sm:$0xff]  ;;  %v460_v13 = vld [vmem:[%s3664_s17 + $0x50] sm:$0xff] }
  0xa8   : > { %583 = vmatpush1.msra.mxu0 %v464_v5  ;;  %2859 = vmatpush1.msra.mxu1 %v464_v5  ;;  %v2409_v14 = vld [vmem:[%s3664_s17 + $0x148] sm:$0xff]  ;;  %v2408_v16 = vld [vmem:[%s3664_s17 + $0x140] sm:$0xff]  ;;  %v2407_v18 = vld [vmem:[%s3664_s17 + $0x138] sm:$0xff] }
  0xa9   : > { %584 = vmatprep.subr.mxu0 %v2413_v6  ;;  %2844 = vmatprep.subr.mxu1 %v2413_v6  ;;  %v459_v15 = vld [vmem:[%s3664_s17 + $0x48] sm:$0xff]  ;;  %v458_v17 = vld [vmem:[%s3664_s17 + $0x40] sm:$0xff]  ;;  %v457_v19 = vld [vmem:[%s3664_s17 + $0x38] sm:$0xff] }
  0xaa   : > { %585 = vmatpush1.msra.mxu0 %v463_v7  ;;  %2860 = vmatpush1.msra.mxu1 %v463_v7  ;;  %v2406_v20 = vld [vmem:[%s3664_s17 + $0x130] sm:$0xff]  ;;  %v2405_v22 = vld [vmem:[%s3664_s17 + $0x128] sm:$0xff]  ;;  %v2404_v24 = vld [vmem:[%s3664_s17 + $0x120] sm:$0xff] }
  0xab   : > { %586 = vmatprep.subr.mxu0 %v2412_v8  ;;  %2845 = vmatprep.subr.mxu1 %v2412_v8  ;;  %v456_v21 = vld [vmem:[%s3664_s17 + $0x30] sm:$0xff]  ;;  %v455_v23 = vld [vmem:[%s3664_s17 + $0x28] sm:$0xff]  ;;  %v454_v25 = vld [vmem:[%s3664_s17 + $0x20] sm:$0xff] }
  0xac   : > { %587 = vmatpush1.msra.mxu0 %v462_v9  ;;  %2861 = vmatpush1.msra.mxu1 %v462_v9  ;;  %v2403_v26 = vld [vmem:[%s3664_s17 + $0x118] sm:$0xff]  ;;  %v2402_v28 = vld [vmem:[%s3664_s17 + $0x110] sm:$0xff]  ;;  %v2401_v30 = vld [vmem:[%s3664_s17 + $0x108] sm:$0xff] }
  0xad   : > { %588 = vmatprep.subr.mxu0 %v2411_v10  ;;  %2846 = vmatprep.subr.mxu1 %v2411_v10  ;;  %v453_v27 = vld [vmem:[%s3664_s17 + $0x18] sm:$0xff]  ;;  %v452_v29 = vld [vmem:[%s3664_s17 + $0x10] sm:$0xff]  ;;  %v451_v31 = vld [vmem:[%s3664_s17 + $0x8] sm:$0xff] }
  0xae   : > { %589 = vmatpush1.msra.mxu0 %v461_v11  ;;  %2862 = vmatpush1.msra.mxu1 %v461_v11  ;;  %v2400_v32 = vld [vmem:[%s3664_s17 + $0x100] sm:$0xff]  ;;  %v551_v40 = vld [vmem:[%s3581_s24 + $0x18] sm:$0xff]  ;;  %v553_v44 = vld [vmem:[%s3581_s24 + $0x28] sm:$0xff] }
  0xaf   : > { %590 = vmatprep.subr.mxu0 %v2410_v12  ;;  %2847 = vmatprep.subr.mxu1 %v2410_v12  ;;  %v450_v33 = vld [vmem:[%s3664_s17] sm:$0xff]  ;;  %v567_v41 = vld [vmem:[%s3581_s24 + $0x98] sm:$0xff]  ;;  %v569_v45 = vld [vmem:[%s3581_s24 + $0xa8] sm:$0xff] }
  0xb0   : > { %591 = vmatpush1.msra.mxu0 %v460_v13  ;;  %2863 = vmatpush1.msra.mxu1 %v460_v13  ;;  %v552_v42 = vld [vmem:[%s3581_s24 + $0x20] sm:$0xff]  ;;  %v554_v46 = vld [vmem:[%s3581_s24 + $0x30] sm:$0xff]  ;;  %v555_v48 = vld [vmem:[%s3581_s24 + $0x38] sm:$0xff] }
  0xb1   : > { %592 = vmatprep.subr.mxu0 %v2409_v14  ;;  %2848 = vmatprep.subr.mxu1 %v2409_v14  ;;  %v568_v43 = vld [vmem:[%s3581_s24 + $0xa0] sm:$0xff]  ;;  %v570_v47 = vld [vmem:[%s3581_s24 + $0xb0] sm:$0xff]  ;;  %v571_v49 = vld [vmem:[%s3581_s24 + $0xb8] sm:$0xff] }
  0xb2   : > { %593 = vmatpush1.msra.mxu0 %v459_v15  ;;  %2864 = vmatpush1.msra.mxu1 %v459_v15  ;;  %v556_v50 = vld [vmem:[%s3581_s24 + $0x40] sm:$0xff]  ;;  %v557_v52 = vld [vmem:[%s3581_s24 + $0x48] sm:$0xff]  ;;  %v558_v54 = vld [vmem:[%s3581_s24 + $0x50] sm:$0xff] }
  0xb3   : > { %594 = vmatprep.subr.mxu0 %v2408_v16  ;;  %2849 = vmatprep.subr.mxu1 %v2408_v16  ;;  %v572_v51 = vld [vmem:[%s3581_s24 + $0xc0] sm:$0xff]  ;;  %v573_v53 = vld [vmem:[%s3581_s24 + $0xc8] sm:$0xff]  ;;  %v574_v55 = vld [vmem:[%s3581_s24 + $0xd0] sm:$0xff] }
  0xb4   : > { %595 = vmatpush1.msra.mxu0 %v458_v17  ;;  %2865 = vmatpush1.msra.mxu1 %v458_v17  ;;  %v559_v56 = vld [vmem:[%s3581_s24 + $0x58] sm:$0xff]  ;;  %v560_v58 = vld [vmem:[%s3581_s24 + $0x60] sm:$0xff]  ;;  %v561_v60 = vld [vmem:[%s3581_s24 + $0x68] sm:$0xff] }
  0xb5   : > { %596 = vmatprep.subr.mxu0 %v2407_v18  ;;  %2850 = vmatprep.subr.mxu1 %v2407_v18  ;;  %v575_v57 = vld [vmem:[%s3581_s24 + $0xd8] sm:$0xff]  ;;  %v576_v59 = vld [vmem:[%s3581_s24 + $0xe0] sm:$0xff]  ;;  %v577_v61 = vld [vmem:[%s3581_s24 + $0xe8] sm:$0xff] }
  0xb6   : > { %597 = vmatpush1.msra.mxu0 %v457_v19  ;;  %2866 = vmatpush1.msra.mxu1 %v457_v19  ;;  %v562_v62 = vld [vmem:[%s3581_s24 + $0x70] sm:$0xff]  ;;  %v563_v0 = vld [vmem:[%s3581_s24 + $0x78] sm:$0xff]  ;;  %v516_v4 = vld [vmem:[#allocation2 + $0x148] sm:$0xff] }
  0xb7   : > { %598 = vmatprep.subr.mxu0 %v2406_v20  ;;  %2851 = vmatprep.subr.mxu1 %v2406_v20  ;;  %v578_v63 = vld [vmem:[%s3581_s24 + $0xf0] sm:$0xff]  ;;  %v579_v2 = vld [vmem:[%s3581_s24 + $0xf8] sm:$0xff]  ;;  %v518_v14 = vld [vmem:[#allocation2 + $0x100] sm:$0xff] }
  0xb8   : > { %599 = vmatpush1.msra.mxu0 %v456_v21  ;;  %2867 = vmatpush1.msra.mxu1 %v456_v21  ;;  %v484_v3 = vld [vmem:[#allocation2 + $0xb0] sm:$0xff]  ;;  %v486_v13 = vld [vmem:[#allocation2 + $0xd8] sm:$0xff]  ;;  %v519_v19 = vld [vmem:[#allocation2 + $0xc8] sm:$0xff] }
  0xb9   : > { %600 = vmatprep.subr.mxu0 %v2405_v22  ;;  %2852 = vmatprep.subr.mxu1 %v2405_v22  ;;  %v485_v7 = vld [vmem:[#allocation2 + $0x1b0] sm:$0xff]  ;;  %v487_v18 = vld [vmem:[#allocation2 + $0x18] sm:$0xff] }
  0xba   : > { %601 = vmatpush1.msra.mxu0 %v455_v23  ;;  %2868 = vmatpush1.msra.mxu1 %v455_v23  ;;  %v517_v8 = vld [vmem:[#allocation2 + $0x1d0] sm:$0xff] }
  0xbb   : > { %602 = vmatprep.subr.mxu0 %v2404_v24  ;;  %2853 = vmatprep.subr.mxu1 %v2404_v24  ;;  %v488_v24 = vld [vmem:[#allocation2 + $0x50] sm:$0xff] }
  0xbc   : > { %603 = vmatpush1.msra.mxu0 %v454_v25  ;;  %2869 = vmatpush1.msra.mxu1 %v454_v25  ;;  %v520_v25 = vld [vmem:[#allocation2 + $0x40] sm:$0xff] }
  0xbd   : > { %604 = vmatprep.subr.mxu0 %v2403_v26  ;;  %2854 = vmatprep.subr.mxu1 %v2403_v26 }
  0xbe   : > { %605 = vmatpush1.msra.mxu0 %v453_v27  ;;  %2870 = vmatpush1.msra.mxu1 %v453_v27 }
  0xbf   : > { %606 = vmatprep.subr.mxu0 %v2402_v28  ;;  %2855 = vmatprep.subr.mxu1 %v2402_v28 }
  0xc0   : > { %607 = vmatpush1.msra.mxu0 %v452_v29  ;;  %2871 = vmatpush1.msra.mxu1 %v452_v29 }
  0xc1   : > { %608 = vmatprep.subr.mxu0 %v2401_v30  ;;  %2856 = vmatprep.subr.mxu1 %v2401_v30  ;;  %v489_v30 = vld [vmem:[#allocation2 + $0x168] sm:$0xff] }
  0xc2   : > { %609 = vmatpush1.msra.mxu0 %v451_v31  ;;  %2872 = vmatpush1.msra.mxu1 %v451_v31  ;;  %v521_v31 = vld [vmem:[#allocation2 + $0x1f8] sm:$0xff] }
  0xc3   : > { %610 = vmatprep.subr.mxu0 %v2400_v32  ;;  %2857 = vmatprep.subr.mxu1 %v2400_v32 }
  0xc4   : > { %611 = vmatpush1.msra.mxu0 %v450_v33  ;;  %2873 = vmatpush1.msra.mxu1 %v450_v33 }
  0xc5   : > { %645 = vmatmul.mubr.f32.vlgmr.msra.gmra.mxu0 %v548_v34  ;;  %741 = vmatmul.mubr.f32.vlgmr.msra.gmra.mxu1 %v564_v35 }
  0xc6   : > { %650 = vmatprep.mubr.f32.mxu0 %v3323_v1  ;;  %746 = vmatprep.mubr.f32.mxu1 %v3323_v1 }
  0xc9   : > { %651 = vmatmul.mubr.f32.gmra.mxu0 %v549_v36  ;;  %747 = vmatmul.mubr.f32.gmra.mxu1 %v565_v37  ;;  %v490_v36 = vld [vmem:[#allocation2 + $0x130] sm:$0xff]  ;;  %v522_v37 = vld [vmem:[#allocation2 + $0x20] sm:$0xff] }
  0xca   : > { %656 = vmatprep.mubr.f32.mxu0 %v3323_v1  ;;  %752 = vmatprep.mubr.f32.mxu1 %v3323_v1 }
  0xcd   : > { %657 = vmatmul.mubr.f32.gmra.mxu0 %v550_v38  ;;  %753 = vmatmul.mubr.f32.gmra.mxu1 %v566_v39 }
  0xce   : > { %662 = vmatprep.mubr.f32.mxu0 %v3323_v1  ;;  %758 = vmatprep.mubr.f32.mxu1 %v3323_v1 }
  0xd1   : > { %663 = vmatmul.mubr.f32.gmra.mxu0 %v551_v40  ;;  %759 = vmatmul.mubr.f32.gmra.mxu1 %v567_v41 }
  0xd2   : > { %668 = vmatprep.mubr.f32.mxu0 %v3323_v1  ;;  %764 = vmatprep.mubr.f32.mxu1 %v3323_v1 }
  0xd5   : > { %669 = vmatmul.mubr.f32.gmra.mxu0 %v552_v42  ;;  %765 = vmatmul.mubr.f32.gmra.mxu1 %v568_v43  ;;  %v491_v42 = vld [vmem:[#allocation2 + $0x48] sm:$0xff] }
  0xd6   : > { %674 = vmatprep.mubr.f32.mxu0 %v3323_v1  ;;  %770 = vmatprep.mubr.f32.mxu1 %v3323_v1  ;;  %v523_v43 = vld [vmem:[#allocation2 + $0x128] sm:$0xff] }
  0xd9   : > { %675 = vmatmul.mubr.f32.gmra.mxu0 %v553_v44  ;;  %771 = vmatmul.mubr.f32.gmra.mxu1 %v569_v45 }
  0xda   : > { %680 = vmatprep.mubr.f32.mxu0 %v3323_v1  ;;  %776 = vmatprep.mubr.f32.mxu1 %v3323_v1 }
  0xdd   : > { %681 = vmatmul.mubr.f32.gmra.mxu0 %v554_v46  ;;  %777 = vmatmul.mubr.f32.gmra.mxu1 %v570_v47 }
  0xde   : > { %686 = vmatprep.mubr.f32.mxu0 %v3323_v1  ;;  %782 = vmatprep.mubr.f32.mxu1 %v3323_v1 }
  0xe1   : > { %687 = vmatmul.mubr.f32.gmra.mxu0 %v555_v48  ;;  %783 = vmatmul.mubr.f32.gmra.mxu1 %v571_v49  ;;  %v492_v48 = vld [vmem:[#allocation2 + $0x180] sm:$0xff] }
  0xe2   : > { %692 = vmatprep.mubr.f32.mxu0 %v3323_v1  ;;  %788 = vmatprep.mubr.f32.mxu1 %v3323_v1  ;;  %v524_v49 = vld [vmem:[#allocation2 + $0x1a0] sm:$0xff] }
  0xe5   : > { %693 = vmatmul.mubr.f32.gmra.mxu0 %v556_v50  ;;  %789 = vmatmul.mubr.f32.gmra.mxu1 %v572_v51 }
  0xe6   : > { %698 = vmatprep.mubr.f32.mxu0 %v3323_v1  ;;  %794 = vmatprep.mubr.f32.mxu1 %v3323_v1 }
  0xe9   : > { %699 = vmatmul.mubr.f32.gmra.mxu0 %v557_v52  ;;  %795 = vmatmul.mubr.f32.gmra.mxu1 %v573_v53 }
  0xea   : > { %704 = vmatprep.mubr.f32.mxu0 %v3323_v1  ;;  %800 = vmatprep.mubr.f32.mxu1 %v3323_v1 }
  0xed   : > { %705 = vmatmul.mubr.f32.gmra.mxu0 %v558_v54  ;;  %801 = vmatmul.mubr.f32.gmra.mxu1 %v574_v55  ;;  %v493_v54 = vld [vmem:[#allocation2 + $0x110] sm:$0xff] }
  0xee   : > { %710 = vmatprep.mubr.f32.mxu0 %v3323_v1  ;;  %806 = vmatprep.mubr.f32.mxu1 %v3323_v1  ;;  %v525_v55 = vld [vmem:[#allocation2 + $0x1f0] sm:$0xff] }
  0xf1   : > { %711 = vmatmul.mubr.f32.gmra.mxu0 %v559_v56  ;;  %807 = vmatmul.mubr.f32.gmra.mxu1 %v575_v57 }
  0xf2   : > { %716 = vmatprep.mubr.f32.mxu0 %v3323_v1  ;;  %812 = vmatprep.mubr.f32.mxu1 %v3323_v1 }
  0xf5   : > { %717 = vmatmul.mubr.f32.gmra.mxu0 %v560_v58  ;;  %813 = vmatmul.mubr.f32.gmra.mxu1 %v576_v59 }
  0xf6   : > { %722 = vmatprep.mubr.f32.mxu0 %v3323_v1  ;;  %818 = vmatprep.mubr.f32.mxu1 %v3323_v1 }
  0xf9   : > { %723 = vmatmul.mubr.f32.gmra.mxu0 %v561_v60  ;;  %819 = vmatmul.mubr.f32.gmra.mxu1 %v577_v61  ;;  %v494_v60 = vld [vmem:[#allocation2 + $0x118] sm:$0xff]  ;;  %v526_v61 = vld [vmem:[#allocation2 + $0xe8] sm:$0xff] }
  0xfa   : > { %728 = vmatprep.mubr.f32.mxu0 %v3323_v1  ;;  %824 = vmatprep.mubr.f32.mxu1 %v3323_v1 }
  0xfd   : > { %729 = vmatmul.mubr.f32.gmra.mxu0 %v562_v62  ;;  %825 = vmatmul.mubr.f32.gmra.mxu1 %v578_v63 }
  0xfe   : > { %734 = vmatprep.mubr.f32.mxu0 %v3323_v1  ;;  %830 = vmatprep.mubr.f32.mxu1 %v3323_v1 }
 0x101   : > { %735 = vmatmul.mubr.f32.gmra.mxu0 %v563_v0  ;;  %831 = vmatmul.mubr.f32.gmra.mxu1 %v579_v2 }
 0x185   : > { %v646_v5 = vpop.f32.mrf.mxu0  ;;  %v742_v6 = vpop.f32.mrf.mxu1 }
 0x186   : > { %v837_v9 = vadd.f32 %v646_v5, %v484_v3  ;;  %v869_v10 = vadd.f32 %v742_v6, %v516_v4  ;;  %v495_v3 = vld [vmem:[#allocation2 + $0x98] sm:$0xff] }
 0x187   : > { %v648_v11 = vpop.f32.mrf.mxu0  ;;  %v744_v12 = vpop.f32.mrf.mxu1  ;;  %v527_v4 = vld [vmem:[#allocation2 + $0x78] sm:$0xff] }
 0x188   : > { %901 = vst [vmem:[#allocation2 + $0xb0] sm:$0xff] %v837_v9  ;;  %933 = vst [vmem:[#allocation2 + $0x148] sm:$0xff] %v869_v10  ;;  %v838_v15 = vadd.f32 %v648_v11, %v485_v7  ;;  %v870_v1 = vadd.f32 %v744_v12, %v517_v8  ;;  %v496_v9 = vld [vmem:[#allocation2 + $0x120] sm:$0xff]  ;;  %v528_v10 = vld [vmem:[#allocation2 + $0x70] sm:$0xff] }
 0x189   : > { %v652_v16 = vpop.f32.mrf.mxu0  ;;  %v748_v17 = vpop.f32.mrf.mxu1 }
 0x18a   : > { %902 = vst [vmem:[#allocation2 + $0x1b0] sm:$0xff] %v838_v15  ;;  %934 = vst [vmem:[#allocation2 + $0x1d0] sm:$0xff] %v870_v1  ;;  %v839_v20 = vadd.f32 %v652_v16, %v486_v13  ;;  %v871_v21 = vadd.f32 %v748_v17, %v518_v14  ;;  %v497_v15 = vld [vmem:[#allocation2 + $0x150] sm:$0xff] }
 0x18b   : > { %v654_v22 = vpop.f32.mrf.mxu0  ;;  %v750_v23 = vpop.f32.mrf.mxu1  ;;  %v529_v1 = vld [vmem:[#allocation2 + $0x90] sm:$0xff] }
 0x18c   : > { %903 = vst [vmem:[#allocation2 + $0xd8] sm:$0xff] %v839_v20  ;;  %935 = vst [vmem:[#allocation2 + $0x100] sm:$0xff] %v871_v21  ;;  %v840_v26 = vadd.f32 %v654_v22, %v487_v18  ;;  %v872_v27 = vadd.f32 %v750_v23, %v519_v19  ;;  %v498_v20 = vld [vmem:[#allocation2 + $0x108] sm:$0xff]  ;;  %v530_v21 = vld [vmem:[#allocation2 + $0x1d8] sm:$0xff] }
 0x18d   : > { %v658_v28 = vpop.f32.mrf.mxu0  ;;  %v754_v29 = vpop.f32.mrf.mxu1 }
 0x18e   : > { %904 = vst [vmem:[#allocation2 + $0x18] sm:$0xff] %v840_v26  ;;  %936 = vst [vmem:[#allocation2 + $0xc8] sm:$0xff] %v872_v27  ;;  %v841_v32 = vadd.f32 %v658_v28, %v488_v24  ;;  %v873_v33 = vadd.f32 %v754_v29, %v520_v25  ;;  %v499_v26 = vld [vmem:[#allocation2 + $0x60] sm:$0xff]  ;;  %v531_v27 = vld [vmem:[#allocation2 + $0xd0] sm:$0xff] }
 0x18f   : > { %v660_v34 = vpop.f32.mrf.mxu0  ;;  %v756_v35 = vpop.f32.mrf.mxu1 }
 0x190   : > { %905 = vst [vmem:[#allocation2 + $0x50] sm:$0xff] %v841_v32  ;;  %937 = vst [vmem:[#allocation2 + $0x40] sm:$0xff] %v873_v33  ;;  %v842_v38 = vadd.f32 %v660_v34, %v489_v30  ;;  %v874_v39 = vadd.f32 %v756_v35, %v521_v31  ;;  %v500_v32 = vld [vmem:[#allocation2 + $0xe0] sm:$0xff]  ;;  %v532_v33 = vld [vmem:[#allocation2 + $0xb8] sm:$0xff] }
 0x191   : > { %v664_v40 = vpop.f32.mrf.mxu0  ;;  %v760_v41 = vpop.f32.mrf.mxu1 }
 0x192   : > { %906 = vst [vmem:[#allocation2 + $0x168] sm:$0xff] %v842_v38  ;;  %938 = vst [vmem:[#allocation2 + $0x1f8] sm:$0xff] %v874_v39  ;;  %v843_v44 = vadd.f32 %v664_v40, %v490_v36  ;;  %v875_v45 = vadd.f32 %v760_v41, %v522_v37  ;;  %v501_v38 = vld [vmem:[#allocation2 + $0x188] sm:$0xff] }
 0x193   : > { %v666_v46 = vpop.f32.mrf.mxu0  ;;  %v762_v47 = vpop.f32.mrf.mxu1  ;;  %v533_v39 = vld [vmem:[#allocation2 + $0x88] sm:$0xff] }
 0x194   : > { %907 = vst [vmem:[#allocation2 + $0x130] sm:$0xff] %v843_v44  ;;  %939 = vst [vmem:[#allocation2 + $0x20] sm:$0xff] %v875_v45  ;;  %v844_v50 = vadd.f32 %v666_v46, %v491_v42  ;;  %v876_v51 = vadd.f32 %v762_v47, %v523_v43  ;;  %v502_v44 = vld [vmem:[#allocation2 + $0x138] sm:$0xff]  ;;  %v534_v45 = vld [vmem:[#allocation2 + $0xa8] sm:$0xff] }
 0x195   : > { %v670_v52 = vpop.f32.mrf.mxu0  ;;  %v766_v53 = vpop.f32.mrf.mxu1 }
 0x196   : > { %908 = vst [vmem:[#allocation2 + $0x48] sm:$0xff] %v844_v50  ;;  %940 = vst [vmem:[#allocation2 + $0x128] sm:$0xff] %v876_v51  ;;  %v845_v56 = vadd.f32 %v670_v52, %v492_v48  ;;  %v877_v57 = vadd.f32 %v766_v53, %v524_v49  ;;  %v503_v50 = vld [vmem:[#allocation2 + $0x140] sm:$0xff]  ;;  %v535_v51 = vld [vmem:[#allocation2 + $0x1c8] sm:$0xff] }
 0x197   : > { %v672_v58 = vpop.f32.mrf.mxu0  ;;  %v768_v59 = vpop.f32.mrf.mxu1 }
 0x198   : > { %909 = vst [vmem:[#allocation2 + $0x180] sm:$0xff] %v845_v56  ;;  %941 = vst [vmem:[#allocation2 + $0x1a0] sm:$0xff] %v877_v57  ;;  %v846_v62 = vadd.f32 %v672_v58, %v493_v54  ;;  %v878_v63 = vadd.f32 %v768_v59, %v525_v55  ;;  %v504_v56 = vld [vmem:[#allocation2 + $0x80] sm:$0xff]  ;;  %v536_v57 = vld [vmem:[#allocation2 + $0x170] sm:$0xff] }
 0x199   : > { %v676_v0 = vpop.f32.mrf.mxu0  ;;  %v772_v2 = vpop.f32.mrf.mxu1 }
 0x19a   : > { %910 = vst [vmem:[#allocation2 + $0x110] sm:$0xff] %v846_v62  ;;  %942 = vst [vmem:[#allocation2 + $0x1f0] sm:$0xff] %v878_v63  ;;  %v847_v5 = vadd.f32 %v676_v0, %v494_v60  ;;  %v879_v6 = vadd.f32 %v772_v2, %v526_v61  ;;  %v505_v62 = vld [vmem:[#allocation2 + $0x1a8] sm:$0xff]  ;;  %v537_v63 = vld [vmem:[#allocation2 + $0x178] sm:$0xff] }
 0x19b   : > { %v678_v7 = vpop.f32.mrf.mxu0  ;;  %v774_v8 = vpop.f32.mrf.mxu1 }
 0x19c   : > { %911 = vst [vmem:[#allocation2 + $0x118] sm:$0xff] %v847_v5  ;;  %943 = vst [vmem:[#allocation2 + $0xe8] sm:$0xff] %v879_v6  ;;  %v848_v11 = vadd.f32 %v678_v7, %v495_v3  ;;  %v880_v12 = vadd.f32 %v774_v8, %v527_v4  ;;  %v506_v5 = vld [vmem:[#allocation2 + $0x1b8] sm:$0xff]  ;;  %v538_v6 = vld [vmem:[#allocation2 + $0x68] sm:$0xff] }
 0x19d   : > { %v682_v13 = vpop.f32.mrf.mxu0  ;;  %v778_v14 = vpop.f32.mrf.mxu1 }
 0x19e   : > { %912 = vst [vmem:[#allocation2 + $0x98] sm:$0xff] %v848_v11  ;;  %944 = vst [vmem:[#allocation2 + $0x78] sm:$0xff] %v880_v12  ;;  %v849_v16 = vadd.f32 %v682_v13, %v496_v9  ;;  %v881_v17 = vadd.f32 %v778_v14, %v528_v10  ;;  %v507_v11 = vld [vmem:[#allocation2 + $0x28] sm:$0xff]  ;;  %v539_v12 = vld [vmem:[#allocation2 + $0x190] sm:$0xff] }
 0x19f   : > { %v684_v18 = vpop.f32.mrf.mxu0  ;;  %v780_v19 = vpop.f32.mrf.mxu1 }
 0x1a0   : > { %913 = vst [vmem:[#allocation2 + $0x120] sm:$0xff] %v849_v16  ;;  %945 = vst [vmem:[#allocation2 + $0x70] sm:$0xff] %v881_v17  ;;  %v850_v22 = vadd.f32 %v684_v18, %v497_v15  ;;  %v882_v23 = vadd.f32 %v780_v19, %v529_v1  ;;  %v508_v16 = vld [vmem:[#allocation2 + $0x1e8] sm:$0xff]  ;;  %v540_v17 = vld [vmem:[#allocation2 + $0x198] sm:$0xff] }
 0x1a1   : > { %v688_v24 = vpop.f32.mrf.mxu0  ;;  %v784_v25 = vpop.f32.mrf.mxu1 }
 0x1a2   : > { %914 = vst [vmem:[#allocation2 + $0x150] sm:$0xff] %v850_v22  ;;  %946 = vst [vmem:[#allocation2 + $0x90] sm:$0xff] %v882_v23  ;;  %v851_v28 = vadd.f32 %v688_v24, %v498_v20  ;;  %v883_v29 = vadd.f32 %v784_v25, %v530_v21  ;;  %v509_v22 = vld [vmem:[#allocation2 + $0xf8] sm:$0xff] }
 0x1a3   : > { %v690_v30 = vpop.f32.mrf.mxu0  ;;  %v786_v31 = vpop.f32.mrf.mxu1  ;;  %v541_v23 = vld [vmem:[#allocation2 + $0x38] sm:$0xff] }
 0x1a4   : > { %915 = vst [vmem:[#allocation2 + $0x108] sm:$0xff] %v851_v28  ;;  %947 = vst [vmem:[#allocation2 + $0x1d8] sm:$0xff] %v883_v29  ;;  %v852_v34 = vadd.f32 %v690_v30, %v499_v26  ;;  %v884_v35 = vadd.f32 %v786_v31, %v531_v27  ;;  %v510_v28 = vld [vmem:[#allocation2 + $0x160] sm:$0xff] }
 0x1a5   : > { %v694_v36 = vpop.f32.mrf.mxu0  ;;  %v790_v37 = vpop.f32.mrf.mxu1  ;;  %v542_v29 = vld [vmem:[#allocation2 + $0xc0] sm:$0xff] }
 0x1a6   : > { %916 = vst [vmem:[#allocation2 + $0x60] sm:$0xff] %v852_v34  ;;  %948 = vst [vmem:[#allocation2 + $0xd0] sm:$0xff] %v884_v35  ;;  %v853_v40 = vadd.f32 %v694_v36, %v500_v32  ;;  %v885_v41 = vadd.f32 %v790_v37, %v532_v33  ;;  %v511_v34 = vld [vmem:[#allocation2 + $0x30] sm:$0xff]  ;;  %v543_v35 = vld [vmem:[#allocation2 + $0x1c0] sm:$0xff] }
 0x1a7   : > { %v696_v42 = vpop.f32.mrf.mxu0  ;;  %v792_v43 = vpop.f32.mrf.mxu1 }
 0x1a8   : > { %917 = vst [vmem:[#allocation2 + $0xe0] sm:$0xff] %v853_v40  ;;  %949 = vst [vmem:[#allocation2 + $0xb8] sm:$0xff] %v885_v41  ;;  %v854_v46 = vadd.f32 %v696_v42, %v501_v38  ;;  %v886_v47 = vadd.f32 %v792_v43, %v533_v39  ;;  %v512_v40 = vld [vmem:[#allocation2 + $0x1e0] sm:$0xff]  ;;  %v544_v41 = vld [vmem:[#allocation2 + $0x158] sm:$0xff] }
 0x1a9   : > { %v700_v48 = vpop.f32.mrf.mxu0  ;;  %v796_v49 = vpop.f32.mrf.mxu1 }
 0x1aa   : > { %918 = vst [vmem:[#allocation2 + $0x188] sm:$0xff] %v854_v46  ;;  %950 = vst [vmem:[#allocation2 + $0x88] sm:$0xff] %v886_v47  ;;  %v855_v52 = vadd.f32 %v700_v48, %v502_v44  ;;  %v887_v53 = vadd.f32 %v796_v49, %v534_v45  ;;  %v513_v46 = vld [vmem:[#allocation2] sm:$0xff]  ;;  %v545_v47 = vld [vmem:[#allocation2 + $0x10] sm:$0xff] }
 0x1ab   : > { %v702_v54 = vpop.f32.mrf.mxu0  ;;  %v798_v55 = vpop.f32.mrf.mxu1 }
 0x1ac   : > { %919 = vst [vmem:[#allocation2 + $0x138] sm:$0xff] %v855_v52  ;;  %951 = vst [vmem:[#allocation2 + $0xa8] sm:$0xff] %v887_v53  ;;  %v856_v58 = vadd.f32 %v702_v54, %v503_v50  ;;  %v888_v59 = vadd.f32 %v798_v55, %v535_v51  ;;  %v514_v52 = vld [vmem:[#allocation2 + $0xf0] sm:$0xff]  ;;  %v546_v53 = vld [vmem:[#allocation2 + $0x58] sm:$0xff] }
 0x1ad   : > { %v706_v60 = vpop.f32.mrf.mxu0  ;;  %v802_v61 = vpop.f32.mrf.mxu1 }
 0x1ae   : > { %920 = vst [vmem:[#allocation2 + $0x140] sm:$0xff] %v856_v58  ;;  %952 = vst [vmem:[#allocation2 + $0x1c8] sm:$0xff] %v888_v59  ;;  %v857_v0 = vadd.f32 %v706_v60, %v504_v56  ;;  %v889_v2 = vadd.f32 %v802_v61, %v536_v57  ;;  %v515_v58 = vld [vmem:[#allocation2 + $0x8] sm:$0xff]  ;;  %v547_v59 = vld [vmem:[#allocation2 + $0xa0] sm:$0xff] }
 0x1af   : > { %v708_v3 = vpop.f32.mrf.mxu0  ;;  %v804_v4 = vpop.f32.mrf.mxu1 }
 0x1b0   : > { %921 = vst [vmem:[#allocation2 + $0x80] sm:$0xff] %v857_v0  ;;  %953 = vst [vmem:[#allocation2 + $0x170] sm:$0xff] %v889_v2  ;;  %v858_v7 = vadd.f32 %v708_v3, %v505_v62  ;;  %v890_v8 = vadd.f32 %v804_v4, %v537_v63 }
 0x1b1   : > { %v712_v9 = vpop.f32.mrf.mxu0  ;;  %v808_v10 = vpop.f32.mrf.mxu1 }
 0x1b2   : > { %922 = vst [vmem:[#allocation2 + $0x1a8] sm:$0xff] %v858_v7  ;;  %954 = vst [vmem:[#allocation2 + $0x178] sm:$0xff] %v890_v8  ;;  %v859_v13 = vadd.f32 %v712_v9, %v506_v5  ;;  %v891_v14 = vadd.f32 %v808_v10, %v538_v6 }
 0x1b3   : > { %v714_v15 = vpop.f32.mrf.mxu0  ;;  %v810_v1 = vpop.f32.mrf.mxu1 }
 0x1b4   : > { %923 = vst [vmem:[#allocation2 + $0x1b8] sm:$0xff] %v859_v13  ;;  %955 = vst [vmem:[#allocation2 + $0x68] sm:$0xff] %v891_v14  ;;  %v860_v18 = vadd.f32 %v714_v15, %v507_v11  ;;  %v892_v19 = vadd.f32 %v810_v1, %v539_v12 }
 0x1b5   : > { %v718_v20 = vpop.f32.mrf.mxu0  ;;  %v814_v21 = vpop.f32.mrf.mxu1 }
 0x1b6   : > { %924 = vst [vmem:[#allocation2 + $0x28] sm:$0xff] %v860_v18  ;;  %956 = vst [vmem:[#allocation2 + $0x190] sm:$0xff] %v892_v19  ;;  %v861_v24 = vadd.f32 %v718_v20, %v508_v16  ;;  %v893_v25 = vadd.f32 %v814_v21, %v540_v17 }
 0x1b7   : > { %v720_v26 = vpop.f32.mrf.mxu0  ;;  %v816_v27 = vpop.f32.mrf.mxu1 }
 0x1b8   : > { %925 = vst [vmem:[#allocation2 + $0x1e8] sm:$0xff] %v861_v24  ;;  %957 = vst [vmem:[#allocation2 + $0x198] sm:$0xff] %v893_v25  ;;  %v862_v30 = vadd.f32 %v720_v26, %v509_v22  ;;  %v894_v31 = vadd.f32 %v816_v27, %v541_v23 }
 0x1b9   : > { %v724_v32 = vpop.f32.mrf.mxu0  ;;  %v820_v33 = vpop.f32.mrf.mxu1 }
 0x1ba   : > { %926 = vst [vmem:[#allocation2 + $0xf8] sm:$0xff] %v862_v30  ;;  %958 = vst [vmem:[#allocation2 + $0x38] sm:$0xff] %v894_v31  ;;  %v863_v36 = vadd.f32 %v724_v32, %v510_v28  ;;  %v895_v37 = vadd.f32 %v820_v33, %v542_v29 }
 0x1bb   : > { %v726_v38 = vpop.f32.mrf.mxu0  ;;  %v822_v39 = vpop.f32.mrf.mxu1 }
 0x1bc   : > { %927 = vst [vmem:[#allocation2 + $0x160] sm:$0xff] %v863_v36  ;;  %959 = vst [vmem:[#allocation2 + $0xc0] sm:$0xff] %v895_v37  ;;  %v864_v42 = vadd.f32 %v726_v38, %v511_v34  ;;  %v896_v43 = vadd.f32 %v822_v39, %v543_v35 }
 0x1bd   : > { %v730_v44 = vpop.f32.mrf.mxu0  ;;  %v826_v45 = vpop.f32.mrf.mxu1 }
 0x1be   : > { %928 = vst [vmem:[#allocation2 + $0x30] sm:$0xff] %v864_v42  ;;  %960 = vst [vmem:[#allocation2 + $0x1c0] sm:$0xff] %v896_v43  ;;  %v865_v48 = vadd.f32 %v730_v44, %v512_v40  ;;  %v897_v49 = vadd.f32 %v826_v45, %v544_v41 }
 0x1bf   : > { %v732_v50 = vpop.f32.mrf.mxu0  ;;  %v828_v51 = vpop.f32.mrf.mxu1 }
 0x1c0   : > { %929 = vst [vmem:[#allocation2 + $0x1e0] sm:$0xff] %v865_v48  ;;  %961 = vst [vmem:[#allocation2 + $0x158] sm:$0xff] %v897_v49  ;;  %v866_v54 = vadd.f32 %v732_v50, %v513_v46  ;;  %v898_v55 = vadd.f32 %v828_v51, %v545_v47 }
 0x1c1   : > { %v736_v56 = vpop.f32.mrf.mxu0  ;;  %v832_v57 = vpop.f32.mrf.mxu1 }
 0x1c2   : > { %930 = vst [vmem:[#allocation2] sm:$0xff] %v866_v54  ;;  %962 = vst [vmem:[#allocation2 + $0x10] sm:$0xff] %v898_v55  ;;  %v867_v60 = vadd.f32 %v736_v56, %v514_v52  ;;  %v899_v61 = vadd.f32 %v832_v57, %v546_v53  ;;  %968 = sbr.rel (%p2416_p1) target bundleno = 1012 (0x3f4), region = 72 }
 0x1c3   : > { %v738_v62 = vpop.f32.mrf.mxu0  ;;  %v834_v63 = vpop.f32.mrf.mxu1 }
 0x1c4   : > { %931 = vst [vmem:[#allocation2 + $0xf0] sm:$0xff] %v867_v60  ;;  %963 = vst [vmem:[#allocation2 + $0x58] sm:$0xff] %v899_v61  ;;  %v868_v0 = vadd.f32 %v738_v62, %v515_v58  ;;  %v900_v2 = vadd.f32 %v834_v63, %v547_v59 }
 0x1c6   : > { %932 = vst [vmem:[#allocation2 + $0x8] sm:$0xff] %v868_v0  ;;  %964 = vst [vmem:[#allocation2 + $0xa0] sm:$0xff] %v900_v2 }
 0x1c7   : > { %v1242_v3 = vld [vmem:[#allocation9 + $0x78] sm:$0xff]  ;;  %v1241_v4 = vld [vmem:[#allocation9 + $0x70] sm:$0xff]  ;;  %v1240_v5 = vld [vmem:[#allocation9 + $0x68] sm:$0xff]  ;;  %v3764_v10 = vstv %s1097_s22 }
 0x1c8   : > { %2586 = vmatprep.subr.mxu0 %v1242_v3  ;;  %v1239_v6 = vld [vmem:[#allocation9 + $0x60] sm:$0xff]  ;;  %v1238_v8 = vld [vmem:[#allocation9 + $0x58] sm:$0xff]  ;;  %v1033_v9 = vld [vmem:[#allocation2 + $0xb0] sm:$0xff] }
 0x1c9   : > { %2587 = vmatpush3.msra.mxu0 %v1242_v3  ;;  %v969_v7 = vld [vmem:[%s3573_s21] sm:$0xff]  ;;  %v1237_v12 = vld [vmem:[#allocation9 + $0x50] sm:$0xff]  ;;  %v1236_v14 = vld [vmem:[#allocation9 + $0x48] sm:$0xff] }
 0x1ca   : > { %2588 = vmatprep.subr.mxu0 %v1241_v4  ;;  %v1099_v11 = vmul.f32 %v3764_v10, %v969_v7  ;;  %v1235_v15 = vld [vmem:[#allocation9 + $0x40] sm:$0xff]  ;;  %v1234_v1 = vld [vmem:[#allocation9 + $0x38] sm:$0xff]  ;;  %v1233_v16 = vld [vmem:[#allocation9 + $0x30] sm:$0xff] }
 0x1cb   : > { %2589 = vmatpush3.msra.mxu0 %v1241_v4  ;;  %v1232_v17 = vld [vmem:[#allocation9 + $0x28] sm:$0xff]  ;;  %v1231_v18 = vld [vmem:[#allocation9 + $0x20] sm:$0xff]  ;;  %v1230_v19 = vld [vmem:[#allocation9 + $0x18] sm:$0xff] }
 0x1cc   : > { %2590 = vmatprep.subr.mxu0 %v1240_v5  ;;  %v1163_v13 = vadd.f32 %v1099_v11, %v1033_v9  ;;  %v970_v20 = vld [vmem:[%s3573_s21 + $0x8] sm:$0xff]  ;;  %v971_v21 = vld [vmem:[%s3573_s21 + $0x10] sm:$0xff]  ;;  %v1035_v25 = vld [vmem:[#allocation2 + $0xd8] sm:$0xff] }
 0x1cd   : > { %2591 = vmatpush3.msra.mxu0 %v1240_v5  ;;  %v1229_v22 = vld [vmem:[#allocation9 + $0x10] sm:$0xff]  ;;  %v1100_v23 = vmul.f32 %v3764_v10, %v970_v20  ;;  %v1228_v24 = vld [vmem:[#allocation9 + $0x8] sm:$0xff]  ;;  %v1101_v26 = vmul.f32 %v3764_v10, %v971_v21  ;;  %v972_v27 = vld [vmem:[%s3573_s21 + $0x18] sm:$0xff] }
 0x1ce   : > { %2592 = vmatprep.subr.mxu0 %v1239_v6  ;;  %2618 = vmatprep.mubr.f32.mxu0 %v1163_v13  ;;  %v1037_v28 = vld [vmem:[#allocation2 + $0x50] sm:$0xff]  ;;  %v973_v29 = vld [vmem:[%s3573_s21 + $0x20] sm:$0xff]  ;;  %v1102_v32 = vmul.f32 %v3764_v10, %v972_v27  ;;  %v974_v36 = vld [vmem:[%s3573_s21 + $0x28] sm:$0xff] }
 0x1cf   : > { %2593 = vmatpush3.msra.mxu0 %v1239_v6  ;;  %v1227_v30 = vld [vmem:[#allocation9] sm:$0xff]  ;;  %v1164_v31 = vadd.f32 %v1100_v23, %v1035_v25  ;;  %v1165_v33 = vadd.f32 %v1101_v26, %v1037_v28  ;;  %v1039_v34 = vld [vmem:[#allocation2 + $0x130] sm:$0xff]  ;;  %v1103_v35 = vmul.f32 %v3764_v10, %v973_v29  ;;  %v1104_v40 = vmul.f32 %v3764_v10, %v974_v36  ;;  %v1043_v42 = vld [vmem:[#allocation2 + $0x118] sm:$0xff] }
 0x1d0   : > { %2594 = vmatprep.subr.mxu0 %v1238_v8  ;;  %v1041_v37 = vld [vmem:[#allocation2 + $0x180] sm:$0xff]  ;;  %v975_v38 = vld [vmem:[%s3573_s21 + $0x30] sm:$0xff]  ;;  %v1166_v39 = vadd.f32 %v1102_v32, %v1039_v34  ;;  %v976_v44 = vld [vmem:[%s3573_s21 + $0x38] sm:$0xff] }
 0x1d1   : > { %2595 = vmatpush3.msra.mxu0 %v1238_v8  ;;  %v1167_v41 = vadd.f32 %v1103_v35, %v1041_v37  ;;  %v1105_v43 = vmul.f32 %v3764_v10, %v975_v38  ;;  %v1045_v45 = vld [vmem:[#allocation2 + $0x120] sm:$0xff]  ;;  %v1168_v47 = vadd.f32 %v1104_v40, %v1043_v42  ;;  %v1106_v48 = vmul.f32 %v3764_v10, %v976_v44  ;;  %v1047_v50 = vld [vmem:[#allocation2 + $0x108] sm:$0xff]  ;;  %v979_v54 = vld [vmem:[%s3573_s21 + $0x50] sm:$0xff] }
 0x1d2   : > { %2596 = vmatprep.subr.mxu0 %v1237_v12  ;;  %v977_v46 = vld [vmem:[%s3573_s21 + $0x40] sm:$0xff]  ;;  %v978_v52 = vld [vmem:[%s3573_s21 + $0x48] sm:$0xff]  ;;  %v1051_v58 = vld [vmem:[#allocation2 + $0x138] sm:$0xff]  ;;  %v1109_v59 = vmul.f32 %v3764_v10, %v979_v54 }
 0x1d3   : > { %2597 = vmatpush3.msra.mxu0 %v1237_v12  ;;  %v1169_v49 = vadd.f32 %v1105_v43, %v1045_v45  ;;  %v1107_v51 = vmul.f32 %v3764_v10, %v977_v46  ;;  %v1049_v53 = vld [vmem:[#allocation2 + $0xe0] sm:$0xff]  ;;  %v1170_v55 = vadd.f32 %v1106_v48, %v1047_v50  ;;  %v1108_v56 = vmul.f32 %v3764_v10, %v978_v52  ;;  %v980_v60 = vld [vmem:[%s3573_s21 + $0x58] sm:$0xff]  ;;  %v982_v5 = vld [vmem:[%s3573_s21 + $0x68] sm:$0xff] }
 0x1d4   : > { %2598 = vmatprep.subr.mxu0 %v1236_v14  ;;  %v1053_v61 = vld [vmem:[#allocation2 + $0x80] sm:$0xff]  ;;  %v1110_v0 = vmul.f32 %v3764_v10, %v980_v60  ;;  %v1055_v3 = vld [vmem:[#allocation2 + $0x1b8] sm:$0xff]  ;;  %v1057_v6 = vld [vmem:[#allocation2 + $0x1e8] sm:$0xff]  ;;  %v1112_v12 = vmul.f32 %v3764_v10, %v982_v5 }
 0x1d5   : > { %2599 = vmatpush3.msra.mxu0 %v1236_v14  ;;  %v1171_v57 = vadd.f32 %v1107_v51, %v1049_v53  ;;  %v981_v62 = vld [vmem:[%s3573_s21 + $0x60] sm:$0xff]  ;;  %v1172_v63 = vadd.f32 %v1108_v56, %v1051_v58  ;;  %v1173_v2 = vadd.f32 %v1109_v59, %v1053_v61  ;;  %v983_v7 = vld [vmem:[%s3573_s21 + $0x70] sm:$0xff]  ;;  %v1714_v8 = vld [vmem:[#allocation10 + $0x78] sm:$0xff] }
 0x1d6   : > { %2600 = vmatprep.subr.mxu0 %v1235_v15  ;;  %v1111_v4 = vmul.f32 %v3764_v10, %v981_v62  ;;  %v1713_v9 = vld [vmem:[#allocation10 + $0x70] sm:$0xff]  ;;  %v1174_v11 = vadd.f32 %v1110_v0, %v1055_v3  ;;  %2714 = vmatprep.subr.mxu1 %v1714_v8  ;;  %v1059_v14 = vld [vmem:[#allocation2 + $0x160] sm:$0xff]  ;;  %v986_v25 = vld [vmem:[%s3573_s21 + $0x88] sm:$0xff] }
 0x1d7   : > { %2601 = vmatpush3.msra.mxu0 %v1235_v15  ;;  %v1113_v15 = vmul.f32 %v3764_v10, %v983_v7  ;;  %2715 = vmatpush3.msra.mxu1 %v1714_v8  ;;  %v1176_v20 = vadd.f32 %v1112_v12, %v1059_v14  ;;  %v1063_v23 = vld [vmem:[#allocation2 + $0xf0] sm:$0xff]  ;;  %v1710_v26 = vld [vmem:[#allocation10 + $0x58] sm:$0xff]  ;;  %v1065_v27 = vld [vmem:[#allocation2 + $0x148] sm:$0xff] }
 0x1d8   : > { %2602 = vmatprep.subr.mxu0 %v1234_v1  ;;  %v1175_v13 = vadd.f32 %v1111_v4, %v1057_v6  ;;  %2716 = vmatprep.subr.mxu1 %v1713_v9  ;;  %v987_v28 = vld [vmem:[%s3573_s21 + $0x90] sm:$0xff]  ;;  %v988_v35 = vld [vmem:[%s3573_s21 + $0x98] sm:$0xff]  ;;  %v1708_v36 = vld [vmem:[#allocation10 + $0x48] sm:$0xff] }
 0x1d9   : > { %2603 = vmatpush3.msra.mxu0 %v1234_v1  ;;  %v984_v1 = vld [vmem:[%s3573_s21 + $0x78] sm:$0xff]  ;;  %2717 = vmatpush3.msra.mxu1 %v1713_v9  ;;  %v1709_v29 = vld [vmem:[#allocation10 + $0x50] sm:$0xff]  ;;  %v1117_v34 = vmul.f32 %v3764_v10, %v987_v28  ;;  %v1069_v37 = vld [vmem:[#allocation2 + $0x40] sm:$0xff] }
 0x1da   : > { %2604 = vmatprep.subr.mxu0 %v1233_v16  ;;  %v1114_v21 = vmul.f32 %v3764_v10, %v984_v1  ;;  %v989_v38 = vld [vmem:[%s3573_s21 + $0xa0] sm:$0xff]  ;;  %v990_v45 = vld [vmem:[%s3573_s21 + $0xa8] sm:$0xff]  ;;  %v1706_v46 = vld [vmem:[#allocation10 + $0x38] sm:$0xff] }
 0x1db   : > { %2605 = vmatpush3.msra.mxu0 %v1233_v16  ;;  %v1712_v16 = vld [vmem:[#allocation10 + $0x68] sm:$0xff]  ;;  %v1181_v42 = vadd.f32 %v1117_v34, %v1069_v37  ;;  %v1071_v43 = vld [vmem:[#allocation2 + $0x20] sm:$0xff]  ;;  %v1119_v44 = vmul.f32 %v3764_v10, %v989_v38  ;;  %v991_v48 = vld [vmem:[%s3573_s21 + $0xb0] sm:$0xff]  ;;  %v1120_v51 = vmul.f32 %v3764_v10, %v990_v45 }
 0x1dc   : > { %2606 = vmatprep.subr.mxu0 %v1232_v17  ;;  %2718 = vmatprep.subr.mxu1 %v1712_v16  ;;  %v1075_v53 = vld [vmem:[#allocation2 + $0xe8] sm:$0xff]  ;;  %v1121_v54 = vmul.f32 %v3764_v10, %v991_v48  ;;  %v993_v58 = vld [vmem:[%s3573_s21 + $0xc0] sm:$0xff]  ;;  %v1081_v3 = vld [vmem:[#allocation2 + $0xb8] sm:$0xff] }
 0x1dd   : > { %2607 = vmatpush3.msra.mxu0 %v1232_v17  ;;  %v1061_v17 = vld [vmem:[#allocation2 + $0x1e0] sm:$0xff]  ;;  %2719 = vmatpush3.msra.mxu1 %v1712_v16  ;;  %v1704_v56 = vld [vmem:[#allocation10 + $0x28] sm:$0xff]  ;;  %v1184_v60 = vadd.f32 %v1120_v51, %v1075_v53  ;;  %v1123_v0 = vmul.f32 %v3764_v10, %v993_v58  ;;  %v995_v4 = vld [vmem:[%s3573_s21 + $0xd0] sm:$0xff] }
 0x1de   : > { %2608 = vmatprep.subr.mxu0 %v1231_v18  ;;  %v1703_v59 = vld [vmem:[#allocation10 + $0x20] sm:$0xff]  ;;  %v1083_v8 = vld [vmem:[#allocation2 + $0xa8] sm:$0xff]  ;;  %v1125_v9 = vmul.f32 %v3764_v10, %v995_v4  ;;  %v1085_v12 = vld [vmem:[#allocation2 + $0x170] sm:$0xff] }
 0x1df   : > { %2609 = vmatpush3.msra.mxu0 %v1231_v18  ;;  %v985_v18 = vld [vmem:[%s3573_s21 + $0x80] sm:$0xff]  ;;  %v1187_v7 = vadd.f32 %v1123_v0, %v1081_v3  ;;  %v1087_v16 = vld [vmem:[#allocation2 + $0x68] sm:$0xff]  ;;  %v1042_v51 = vld [vmem:[#allocation2 + $0x110] sm:$0xff] }
 0x1e0   : > { %2610 = vmatprep.subr.mxu0 %v1230_v19  ;;  %v1189_v1 = vadd.f32 %v1125_v9, %v1085_v12  ;;  %v1001_v28 = vld [vmem:[%s3573_s21 + $0x100] sm:$0xff]  ;;  %v1002_v34 = vld [vmem:[%s3573_s21 + $0x108] sm:$0xff]  ;;  %v1702_v53 = vld [vmem:[#allocation10 + $0x18] sm:$0xff] }
 0x1e1   : > { %2611 = vmatpush3.msra.mxu0 %v1230_v19  ;;  %v1711_v19 = vld [vmem:[#allocation10 + $0x60] sm:$0xff]  ;;  %v1132_v38 = vmul.f32 %v3764_v10, %v1002_v34  ;;  %v1040_v48 = vld [vmem:[#allocation2 + $0x48] sm:$0xff]  ;;  %v1011_v9 = vld [vmem:[%s3573_s21 + $0x150] sm:$0xff] }
 0x1e2   : > { %2612 = vmatprep.subr.mxu0 %v1229_v22  ;;  %2720 = vmatprep.subr.mxu1 %v1711_v19  ;;  %v1048_v4 = vld [vmem:[#allocation2 + $0x60] sm:$0xff] }
 0x1e3   : > { %2613 = vmatpush3.msra.mxu0 %v1229_v22  ;;  %v1177_v22 = vadd.f32 %v1113_v15, %v1061_v17  ;;  %2721 = vmatpush3.msra.mxu1 %v1711_v19  ;;  %v1089_v19 = vld [vmem:[#allocation2 + $0x198] sm:$0xff] }
 0x1e4   : > { %2614 = vmatprep.subr.mxu0 %v1228_v24  ;;  %2722 = vmatprep.subr.mxu1 %v1710_v26 }
 0x1e5   : > { %2615 = vmatpush3.msra.mxu0 %v1228_v24  ;;  %v1115_v24 = vmul.f32 %v3764_v10, %v985_v18  ;;  %2723 = vmatpush3.msra.mxu1 %v1710_v26  ;;  %v998_v18 = vld [vmem:[%s3573_s21 + $0xe8] sm:$0xff]  ;;  %v1000_v26 = vld [vmem:[%s3573_s21 + $0xf8] sm:$0xff] }
 0x1e6   : > { %2616 = vmatprep.subr.mxu0 %v1227_v30  ;;  %2724 = vmatprep.subr.mxu1 %v1709_v29 }
 0x1e7   : > { %2617 = vmatpush3.msra.mxu0 %v1227_v30  ;;  %v1178_v30 = vadd.f32 %v1114_v21, %v1063_v23  ;;  %v1179_v32 = vadd.f32 %v1115_v24, %v1065_v27  ;;  %2725 = vmatpush3.msra.mxu1 %v1709_v29  ;;  %v1091_v24 = vld [vmem:[#allocation2 + $0xc0] sm:$0xff]  ;;  %v1093_v27 = vld [vmem:[#allocation2 + $0x158] sm:$0xff] }
 0x1e8   : > { %2619 = vmatmul.mubr.f32.vlgmr.msra.gmra.mxu0 %v1164_v31  ;;  %v1116_v31 = vmul.f32 %v3764_v10, %v986_v25  ;;  %2726 = vmatprep.subr.mxu1 %v1708_v36 }
 0x1e9   : > { %2621 = vmatprep.mubr.f32.mxu0 %v1165_v33  ;;  %v1067_v33 = vld [vmem:[#allocation2 + $0x100] sm:$0xff]  ;;  %2727 = vmatpush3.msra.mxu1 %v1708_v36  ;;  %v1003_v36 = vld [vmem:[%s3573_s21 + $0x110] sm:$0xff] }
 0x1ea   : > { %v1180_v40 = vadd.f32 %v1116_v31, %v1067_v33  ;;  %v1131_v33 = vmul.f32 %v3764_v10, %v1001_v28 }
 0x1ec   : > { %2622 = vmatmul.mubr.f32.gmra.mxu0 %v1166_v39  ;;  %v1707_v39 = vld [vmem:[#allocation10 + $0x40] sm:$0xff] }
 0x1ed   : > { %2624 = vmatprep.mubr.f32.mxu0 %v1167_v41  ;;  %v1118_v41 = vmul.f32 %v3764_v10, %v988_v35  ;;  %2728 = vmatprep.subr.mxu1 %v1707_v39  ;;  %v1034_v35 = vld [vmem:[#allocation2 + $0x1b0] sm:$0xff] }
 0x1ee   : > { %2729 = vmatpush3.msra.mxu1 %v1707_v39  ;;  %v1195_v39 = vadd.f32 %v1131_v33, %v1034_v35  ;;  %v1017_v33 = vld [vmem:[%s3573_s21 + $0x180] sm:$0xff] }
 0x1ef   : > { %v1182_v50 = vadd.f32 %v1118_v41, %v1071_v43  ;;  %2730 = vmatprep.subr.mxu1 %v1706_v46  ;;  %v1133_v41 = vmul.f32 %v3764_v10, %v1003_v36  ;;  %v1038_v43 = vld [vmem:[#allocation2 + $0x168] sm:$0xff] }
 0x1f0   : > { %2625 = vmatmul.mubr.f32.gmra.mxu0 %v1168_v47  ;;  %v1073_v47 = vld [vmem:[#allocation2 + $0x1a0] sm:$0xff]  ;;  %2731 = vmatpush3.msra.mxu1 %v1706_v46 }
 0x1f1   : > { %2627 = vmatprep.mubr.f32.mxu0 %v1169_v49  ;;  %v1705_v49 = vld [vmem:[#allocation10 + $0x30] sm:$0xff]  ;;  %v1183_v52 = vadd.f32 %v1119_v44, %v1073_v47  ;;  %v1005_v44 = vld [vmem:[%s3573_s21 + $0x120] sm:$0xff]  ;;  %v1197_v47 = vadd.f32 %v1133_v41, %v1038_v43 }
 0x1f2   : > { %2732 = vmatprep.subr.mxu1 %v1705_v49  ;;  %v1019_v41 = vld [vmem:[%s3573_s21 + $0x190] sm:$0xff] }
 0x1f3   : > { %2733 = vmatpush3.msra.mxu1 %v1705_v49  ;;  %v1135_v49 = vmul.f32 %v3764_v10, %v1005_v44 }
 0x1f4   : > { %2628 = vmatmul.mubr.f32.gmra.mxu0 %v1170_v55  ;;  %v992_v55 = vld [vmem:[%s3573_s21 + $0xb8] sm:$0xff]  ;;  %2734 = vmatprep.subr.mxu1 %v1704_v56 }
 0x1f5   : > { %2630 = vmatprep.mubr.f32.mxu0 %v1171_v57  ;;  %v1077_v57 = vld [vmem:[#allocation2 + $0x70] sm:$0xff]  ;;  %v1122_v61 = vmul.f32 %v3764_v10, %v992_v55  ;;  %2735 = vmatpush3.msra.mxu1 %v1704_v56  ;;  %v1199_v56 = vadd.f32 %v1135_v49, %v1042_v51  ;;  %v1021_v49 = vld [vmem:[%s3573_s21 + $0x1a0] sm:$0xff] }
 0x1f6   : > { %v1185_v62 = vadd.f32 %v1121_v54, %v1077_v57  ;;  %2736 = vmatprep.subr.mxu1 %v1703_v59  ;;  %v1044_v57 = vld [vmem:[#allocation2 + $0x98] sm:$0xff] }
 0x1f7   : > { %2737 = vmatpush3.msra.mxu1 %v1703_v59  ;;  %v1008_v59 = vld [vmem:[%s3573_s21 + $0x138] sm:$0xff] }
 0x1f8   : > { %2631 = vmatmul.mubr.f32.gmra.mxu0 %v1172_v63  ;;  %v1079_v63 = vld [vmem:[#allocation2 + $0x1d8] sm:$0xff]  ;;  %2738 = vmatprep.subr.mxu1 %v1702_v53 }
 0x1f9   : > { %2633 = vmatprep.mubr.f32.mxu0 %v1173_v2  ;;  %v994_v2 = vld [vmem:[%s3573_s21 + $0xc8] sm:$0xff]  ;;  %v1186_v5 = vadd.f32 %v1122_v61, %v1079_v63  ;;  %2739 = vmatpush3.msra.mxu1 %v1702_v53  ;;  %v1046_v61 = vld [vmem:[#allocation2 + $0x150] sm:$0xff] }
 0x1fa   : > { %v1124_v6 = vmul.f32 %v3764_v10, %v994_v2  ;;  %v1700_v63 = vld [vmem:[#allocation10 + $0x8] sm:$0xff]  ;;  %v1138_v2 = vmul.f32 %v3764_v10, %v1008_v59 }
 0x1fb   : > { %v1072_v53 = vld [vmem:[#allocation2 + $0x128] sm:$0xff] }
 0x1fc   : > { %2634 = vmatmul.mubr.f32.gmra.mxu0 %v1174_v11  ;;  %v996_v11 = vld [vmem:[%s3573_s21 + $0xd8] sm:$0xff]  ;;  %v1188_v14 = vadd.f32 %v1124_v6, %v1083_v8  ;;  %v1010_v6 = vld [vmem:[%s3573_s21 + $0x148] sm:$0xff] }
 0x1fd   : > { %2636 = vmatprep.mubr.f32.mxu0 %v1175_v13  ;;  %v997_v13 = vld [vmem:[%s3573_s21 + $0xe0] sm:$0xff]  ;;  %v1126_v15 = vmul.f32 %v3764_v10, %v996_v11  ;;  %v1050_v8 = vld [vmem:[#allocation2 + $0x188] sm:$0xff]  ;;  %v1202_v11 = vadd.f32 %v1138_v2, %v1048_v4  ;;  %v1140_v12 = vmul.f32 %v3764_v10, %v1010_v6  ;;  %v1080_v6 = vld [vmem:[#allocation2 + $0xd0] sm:$0xff] }
 0x1fe   : > { %v1127_v17 = vmul.f32 %v3764_v10, %v997_v13  ;;  %v1025_v2 = vld [vmem:[%s3573_s21 + $0x1c0] sm:$0xff] }
 0x1ff   : > { %v1190_v21 = vadd.f32 %v1126_v15, %v1087_v16  ;;  %v1141_v15 = vmul.f32 %v3764_v10, %v1011_v9  ;;  %v1054_v16 = vld [vmem:[#allocation2 + $0x1a8] sm:$0xff] }
 0x200   : > { %2637 = vmatmul.mubr.f32.gmra.mxu0 %v1176_v20  ;;  %v999_v20 = vld [vmem:[%s3573_s21 + $0xf0] sm:$0xff]  ;;  %v1191_v23 = vadd.f32 %v1127_v17, %v1089_v19  ;;  %v1013_v17 = vld [vmem:[%s3573_s21 + $0x160] sm:$0xff]  ;;  %v1082_v9 = vld [vmem:[#allocation2 + $0x88] sm:$0xff] }
 0x201   : > { %2639 = vmatprep.mubr.f32.mxu0 %v1177_v22  ;;  %v1128_v22 = vmul.f32 %v3764_v10, %v998_v18  ;;  %v1129_v25 = vmul.f32 %v3764_v10, %v999_v20  ;;  %v1205_v20 = vadd.f32 %v1141_v15, %v1054_v16  ;;  %v1084_v15 = vld [vmem:[#allocation2 + $0x1c8] sm:$0xff]  ;;  %v1028_v16 = vld [vmem:[%s3573_s21 + $0x1d8] sm:$0xff] }
 0x203   : > { %v1192_v29 = vadd.f32 %v1128_v22, %v1091_v24  ;;  %v1193_v31 = vadd.f32 %v1129_v25, %v1093_v27  ;;  %v1143_v22 = vmul.f32 %v3764_v10, %v1013_v17  ;;  %v1058_v24 = vld [vmem:[#allocation2 + $0xf8] sm:$0xff]  ;;  %v1015_v25 = vld [vmem:[%s3573_s21 + $0x170] sm:$0xff] }
 0x204   : > { %2640 = vmatmul.mubr.f32.gmra.mxu0 %v1178_v30  ;;  %v1130_v30 = vmul.f32 %v3764_v10, %v1000_v26  ;;  %v1086_v17 = vld [vmem:[#allocation2 + $0x178] sm:$0xff] }
 0x205   : > { %2642 = vmatprep.mubr.f32.mxu0 %v1179_v32  ;;  %v1095_v32 = vld [vmem:[#allocation2 + $0x58] sm:$0xff]  ;;  %v1207_v28 = vadd.f32 %v1143_v22, %v1058_v24  ;;  %v1088_v22 = vld [vmem:[#allocation2 + $0x190] sm:$0xff]  ;;  %v1030_v24 = vld [vmem:[%s3573_s21 + $0x1e8] sm:$0xff] }
 0x206   : > { %v1194_v37 = vadd.f32 %v1130_v30, %v1095_v32  ;;  %v1145_v30 = vmul.f32 %v3764_v10, %v1015_v25  ;;  %v1062_v32 = vld [vmem:[#allocation2] sm:$0xff]  ;;  %v1090_v25 = vld [vmem:[#allocation2 + $0x38] sm:$0xff] }
 0x208   : > { %2643 = vmatmul.mubr.f32.gmra.mxu0 %v1180_v40  ;;  %v1036_v40 = vld [vmem:[#allocation2 + $0x18] sm:$0xff]  ;;  %v1209_v36 = vadd.f32 %v1145_v30, %v1062_v32  ;;  %v1092_v30 = vld [vmem:[#allocation2 + $0x1c0] sm:$0xff] }
 0x209   : > { %2645 = vmatprep.mubr.f32.mxu0 %v1181_v42  ;;  %v1004_v42 = vld [vmem:[%s3573_s21 + $0x118] sm:$0xff]  ;;  %v1196_v45 = vadd.f32 %v1132_v38, %v1036_v40  ;;  %v1147_v38 = vmul.f32 %v3764_v10, %v1017_v33  ;;  %v1066_v40 = vld [vmem:[#allocation2 + $0x1d0] sm:$0xff] }
 0x20a   : > { %v1134_v46 = vmul.f32 %v3764_v10, %v1004_v42  ;;  %v1032_v32 = vld [vmem:[%s3573_s21 + $0x1f8] sm:$0xff]  ;;  %v1094_v33 = vld [vmem:[#allocation2 + $0x10] sm:$0xff] }
 0x20b   : > { %v1211_v44 = vadd.f32 %v1147_v38, %v1066_v40 }
 0x20c   : > { %2646 = vmatmul.mubr.f32.gmra.mxu0 %v1182_v50  ;;  %v1006_v50 = vld [vmem:[%s3573_s21 + $0x128] sm:$0xff]  ;;  %v1198_v54 = vadd.f32 %v1134_v46, %v1040_v48  ;;  %v1149_v46 = vmul.f32 %v3764_v10, %v1019_v41  ;;  %v1070_v48 = vld [vmem:[#allocation2 + $0x1f8] sm:$0xff] }
 0x20d   : > { %2648 = vmatprep.mubr.f32.mxu0 %v1183_v52  ;;  %v1007_v52 = vld [vmem:[%s3573_s21 + $0x130] sm:$0xff]  ;;  %v1136_v55 = vmul.f32 %v3764_v10, %v1006_v50 }
 0x20e   : > { %v1137_v58 = vmul.f32 %v3764_v10, %v1007_v52  ;;  %v1213_v52 = vadd.f32 %v1149_v46, %v1070_v48 }
 0x20f   : > { %v1200_v0 = vadd.f32 %v1136_v55, %v1044_v57  ;;  %v1022_v55 = vld [vmem:[%s3573_s21 + $0x1a8] sm:$0xff]  ;;  %v1023_v57 = vld [vmem:[%s3573_s21 + $0x1b0] sm:$0xff] }
 0x210   : > { %2649 = vmatmul.mubr.f32.gmra.mxu0 %v1184_v60  ;;  %v1701_v60 = vld [vmem:[#allocation10 + $0x10] sm:$0xff]  ;;  %v1201_v3 = vadd.f32 %v1137_v58, %v1046_v61  ;;  %v1152_v59 = vmul.f32 %v3764_v10, %v1022_v55  ;;  %v1076_v61 = vld [vmem:[#allocation2 + $0x78] sm:$0xff] }
 0x211   : > { %2651 = vmatprep.mubr.f32.mxu0 %v1185_v62  ;;  %v1009_v62 = vld [vmem:[%s3573_s21 + $0x140] sm:$0xff]  ;;  %2740 = vmatprep.subr.mxu1 %v1701_v60 }
 0x212   : > { %2741 = vmatpush3.msra.mxu1 %v1701_v60 }
 0x213   : > { %2742 = vmatprep.subr.mxu1 %v1700_v63 }
 0x214   : > { %2652 = vmatmul.mubr.f32.gmra.mxu0 %v1186_v5  ;;  %v1139_v5 = vmul.f32 %v3764_v10, %v1009_v62  ;;  %2743 = vmatpush3.msra.mxu1 %v1700_v63  ;;  %v1153_v62 = vmul.f32 %v3764_v10, %v1023_v57  ;;  %v1024_v63 = vld [vmem:[%s3573_s21 + $0x1b8] sm:$0xff] }
 0x215   : > { %2654 = vmatprep.mubr.f32.mxu0 %v1187_v7  ;;  %v1699_v7 = vld [vmem:[#allocation10] sm:$0xff]  ;;  %v1154_v4 = vmul.f32 %v3764_v10, %v1024_v63 }
 0x216   : > { %2744 = vmatprep.subr.mxu1 %v1699_v7  ;;  %v1203_v13 = vadd.f32 %v1139_v5, %v1050_v8  ;;  %v1026_v8 = vld [vmem:[%s3573_s21 + $0x1c8] sm:$0xff] }
 0x217   : > { %2745 = vmatpush3.msra.mxu1 %v1699_v7  ;;  %v1155_v7 = vmul.f32 %v3764_v10, %v1025_v2 }
 0x218   : > { %2655 = vmatmul.mubr.f32.gmra.mxu0 %v1188_v14  ;;  %v1052_v14 = vld [vmem:[#allocation2 + $0x140] sm:$0xff] }
 0x219   : > { %2657 = vmatprep.mubr.f32.mxu0 %v1189_v1  ;;  %v1012_v1 = vld [vmem:[%s3573_s21 + $0x158] sm:$0xff]  ;;  %v1204_v18 = vadd.f32 %v1140_v12, %v1052_v14  ;;  %v1218_v12 = vadd.f32 %v1154_v4, %v1080_v6  ;;  %v1219_v14 = vadd.f32 %v1155_v7, %v1082_v9 }
 0x21a   : > { %v1142_v19 = vmul.f32 %v3764_v10, %v1012_v1 }
 0x21c   : > { %2658 = vmatmul.mubr.f32.gmra.mxu0 %v1190_v21  ;;  %v1056_v21 = vld [vmem:[#allocation2 + $0x28] sm:$0xff] }
 0x21d   : > { %2660 = vmatprep.mubr.f32.mxu0 %v1191_v23  ;;  %v1014_v23 = vld [vmem:[%s3573_s21 + $0x168] sm:$0xff]  ;;  %v1206_v26 = vadd.f32 %v1142_v19, %v1056_v21 }
 0x21e   : > { %v1144_v27 = vmul.f32 %v3764_v10, %v1014_v23 }
 0x220   : > { %2661 = vmatmul.mubr.f32.gmra.mxu0 %v1192_v29  ;;  %v1060_v29 = vld [vmem:[#allocation2 + $0x30] sm:$0xff] }
 0x221   : > { %2663 = vmatprep.mubr.f32.mxu0 %v1193_v31  ;;  %v1016_v31 = vld [vmem:[%s3573_s21 + $0x178] sm:$0xff]  ;;  %v1208_v34 = vadd.f32 %v1144_v27, %v1060_v29 }
 0x222   : > { %v1146_v35 = vmul.f32 %v3764_v10, %v1016_v31 }
 0x224   : > { %2664 = vmatmul.mubr.f32.gmra.mxu0 %v1194_v37  ;;  %v1064_v37 = vld [vmem:[#allocation2 + $0x8] sm:$0xff] }
 0x225   : > { %2666 = vmatprep.mubr.f32.mxu0 %v1195_v39  ;;  %v1018_v39 = vld [vmem:[%s3573_s21 + $0x188] sm:$0xff]  ;;  %v1210_v42 = vadd.f32 %v1146_v35, %v1064_v37  ;;  %v1162_v35 = vmul.f32 %v3764_v10, %v1032_v32  ;;  %v1096_v37 = vld [vmem:[#allocation2 + $0xa0] sm:$0xff] }
 0x226   : > { %v1148_v43 = vmul.f32 %v3764_v10, %v1018_v39  ;;  %v3896_v39 = vld [vmem:[%s4290_s14] ss:$0 sm:$0xff] }
 0x227   : > { %v1226_v38 = vadd.f32 %v1162_v35, %v1096_v37 }
 0x228   : > { %2667 = vmatmul.mubr.f32.gmra.mxu0 %v1196_v45  ;;  %v1068_v45 = vld [vmem:[#allocation2 + $0xc8] sm:$0xff] }
 0x229   : > { %2669 = vmatprep.mubr.f32.mxu0 %v1197_v47  ;;  %v1020_v47 = vld [vmem:[%s3573_s21 + $0x198] sm:$0xff]  ;;  %v1212_v50 = vadd.f32 %v1148_v43, %v1068_v45 }
 0x22a   : > { %v1150_v51 = vmul.f32 %v3764_v10, %v1020_v47 }
 0x22c   : > { %2670 = vmatmul.mubr.f32.gmra.mxu0 %v1198_v54  ;;  %v1151_v54 = vmul.f32 %v3764_v10, %v1021_v49  ;;  %v1214_v58 = vadd.f32 %v1150_v51, %v1072_v53 }
 0x22d   : > { %2672 = vmatprep.mubr.f32.mxu0 %v1199_v56  ;;  %v1074_v56 = vld [vmem:[#allocation2 + $0x1f0] sm:$0xff] }
 0x22e   : > { %v1215_v60 = vadd.f32 %v1151_v54, %v1074_v56 }
 0x230   : > { %2673 = vmatmul.mubr.f32.gmra.mxu0 %v1200_v0  ;;  %v1078_v0 = vld [vmem:[#allocation2 + $0x90] sm:$0xff] }
 0x231   : > { %2675 = vmatprep.mubr.f32.mxu0 %v1201_v3  ;;  %v1216_v3 = vadd.f32 %v1152_v59, %v1076_v61  ;;  %v1217_v5 = vadd.f32 %v1153_v62, %v1078_v0 }
 0x234   : > { %2676 = vmatmul.mubr.f32.gmra.mxu0 %v1202_v11  ;;  %v1027_v11 = vld [vmem:[%s3573_s21 + $0x1d0] sm:$0xff] }
 0x235   : > { %2678 = vmatprep.mubr.f32.mxu0 %v1203_v13  ;;  %v1156_v13 = vmul.f32 %v3764_v10, %v1026_v8  ;;  %v1157_v1 = vmul.f32 %v3764_v10, %v1027_v11 }
 0x237   : > { %v1220_v19 = vadd.f32 %v1156_v13, %v1084_v15  ;;  %v1221_v21 = vadd.f32 %v1157_v1, %v1086_v17 }
 0x238   : > { %2679 = vmatmul.mubr.f32.gmra.mxu0 %v1204_v18  ;;  %v1029_v18 = vld [vmem:[%s3573_s21 + $0x1e0] sm:$0xff] }
 0x239   : > { %2681 = vmatprep.mubr.f32.mxu0 %v1205_v20  ;;  %v1158_v20 = vmul.f32 %v3764_v10, %v1028_v16  ;;  %v1159_v23 = vmul.f32 %v3764_v10, %v1029_v18 }
 0x23b   : > { %v1222_v27 = vadd.f32 %v1158_v20, %v1088_v22  ;;  %v1223_v29 = vadd.f32 %v1159_v23, %v1090_v25 }
 0x23c   : > { %2682 = vmatmul.mubr.f32.gmra.mxu0 %v1206_v26  ;;  %v1031_v26 = vld [vmem:[%s3573_s21 + $0x1f0] sm:$0xff] }
 0x23d   : > { %2684 = vmatprep.mubr.f32.mxu0 %v1207_v28  ;;  %v1160_v28 = vmul.f32 %v3764_v10, %v1030_v24  ;;  %v1161_v31 = vmul.f32 %v3764_v10, %v1031_v26 }
 0x240   : > { %2685 = vmatmul.mubr.f32.gmra.mxu0 %v1208_v34  ;;  %v1224_v34 = vadd.f32 %v1160_v28, %v1092_v30 }
 0x241   : > { %2687 = vmatprep.mubr.f32.mxu0 %v1209_v36  ;;  %v1225_v36 = vadd.f32 %v1161_v31, %v1094_v33 }
 0x244   : > { %2688 = vmatmul.mubr.f32.gmra.mxu0 %v1210_v42 }
 0x245   : > { %2690 = vmatprep.mubr.f32.mxu0 %v1211_v44 }
 0x248   : > { %2691 = vmatmul.mubr.f32.gmra.mxu0 %v1212_v50 }
 0x249   : > { %2693 = vmatprep.mubr.f32.mxu0 %v1213_v52 }
 0x24c   : > { %2694 = vmatmul.mubr.f32.gmra.mxu0 %v1214_v58 }
 0x24d   : > { %2696 = vmatprep.mubr.f32.mxu0 %v1215_v60 }
 0x250   : > { %2697 = vmatmul.mubr.f32.gmra.mxu0 %v1216_v3 }
 0x251   : > { %2699 = vmatprep.mubr.f32.mxu0 %v1217_v5 }
 0x254   : > { %2700 = vmatmul.mubr.f32.gmra.mxu0 %v1218_v12 }
 0x255   : > { %2702 = vmatprep.mubr.f32.mxu0 %v1219_v14 }
 0x258   : > { %2703 = vmatmul.mubr.f32.gmra.mxu0 %v1220_v19 }
 0x259   : > { %2705 = vmatprep.mubr.f32.mxu0 %v1221_v21 }
 0x25c   : > { %2706 = vmatmul.mubr.f32.gmra.mxu0 %v1222_v27 }
 0x25d   : > { %2708 = vmatprep.mubr.f32.mxu0 %v1223_v29 }
 0x260   : > { %2709 = vmatmul.mubr.f32.gmra.mxu0 %v1224_v34 }
 0x261   : > { %2711 = vmatprep.mubr.f32.mxu0 %v1225_v36 }
 0x264   : > { %2712 = vmatmul.mubr.f32.gmra.mxu0 %v1226_v38 }
 0x2a8   : > { %v2620_v40 = vpop.f32.mrf.mxu0 }
 0x2a9   : > { %v1322_v41 = vadd.f32 %v2620_v40, %v3896_v39 }
 0x2aa   : > { %v1316_v42 = vpop.f32.mrf.mxu0 }
 0x2ab   : > { %v1317_v43 = vadd.f32 %v3896_v39, %v1316_v42  ;;  %v1636_v45 = vmax.f32 %v1322_v41, 0.0 }
 0x2ac   : > { %v2623_v44 = vpop.f32.mrf.mxu0 }
 0x2ad   : > { %v1635_v10 = vmax.f32 %v1317_v43, 0.0  ;;  %v1332_v46 = vadd.f32 %v2623_v44, %v3896_v39 }
 0x2ae   : > { %v1326_v47 = vpop.f32.mrf.mxu0 }
 0x2af   : > { %v1327_v48 = vadd.f32 %v3896_v39, %v1326_v47  ;;  %2746 = vmatprep.mubr.f32.mxu1 %v1635_v10  ;;  %v1638_v51 = vmax.f32 %v1332_v46, 0.0 }
 0x2b0   : > { %v2626_v49 = vpop.f32.mrf.mxu0  ;;  %2747 = vmatmul.mubr.f32.vlgmr.msra.gmra.mxu1 %v1636_v45 }
 0x2b1   : > { %v1637_v50 = vmax.f32 %v1327_v48, 0.0  ;;  %v1342_v52 = vadd.f32 %v2626_v49, %v3896_v39 }
 0x2b2   : > { %v1336_v53 = vpop.f32.mrf.mxu0 }
 0x2b3   : > { %v1337_v54 = vadd.f32 %v3896_v39, %v1336_v53  ;;  %2749 = vmatprep.mubr.f32.mxu1 %v1637_v50  ;;  %v1640_v57 = vmax.f32 %v1342_v52, 0.0 }
 0x2b4   : > { %v2629_v55 = vpop.f32.mrf.mxu0  ;;  %2750 = vmatmul.mubr.f32.gmra.mxu1 %v1638_v51 }
 0x2b5   : > { %v1639_v56 = vmax.f32 %v1337_v54, 0.0  ;;  %v1352_v58 = vadd.f32 %v2629_v55, %v3896_v39 }
 0x2b6   : > { %v1346_v59 = vpop.f32.mrf.mxu0 }
 0x2b7   : > { %v1347_v60 = vadd.f32 %v3896_v39, %v1346_v59  ;;  %2752 = vmatprep.mubr.f32.mxu1 %v1639_v56  ;;  %v1642_v63 = vmax.f32 %v1352_v58, 0.0 }
 0x2b8   : > { %v2632_v61 = vpop.f32.mrf.mxu0  ;;  %2753 = vmatmul.mubr.f32.gmra.mxu1 %v1640_v57 }
 0x2b9   : > { %v1641_v62 = vmax.f32 %v1347_v60, 0.0  ;;  %v1362_v0 = vadd.f32 %v2632_v61, %v3896_v39 }
 0x2ba   : > { %v1356_v2 = vpop.f32.mrf.mxu0 }
 0x2bb   : > { %v1357_v3 = vadd.f32 %v3896_v39, %v1356_v2  ;;  %2755 = vmatprep.mubr.f32.mxu1 %v1641_v62  ;;  %v1644_v6 = vmax.f32 %v1362_v0, 0.0 }
 0x2bc   : > { %v2635_v4 = vpop.f32.mrf.mxu0  ;;  %2756 = vmatmul.mubr.f32.gmra.mxu1 %v1642_v63 }
 0x2bd   : > { %v1643_v5 = vmax.f32 %v1357_v3, 0.0  ;;  %v1372_v7 = vadd.f32 %v2635_v4, %v3896_v39 }
 0x2be   : > { %v1366_v8 = vpop.f32.mrf.mxu0 }
 0x2bf   : > { %v1367_v9 = vadd.f32 %v3896_v39, %v1366_v8  ;;  %2758 = vmatprep.mubr.f32.mxu1 %v1643_v5  ;;  %v1646_v13 = vmax.f32 %v1372_v7, 0.0 }
 0x2c0   : > { %v2638_v11 = vpop.f32.mrf.mxu0  ;;  %2759 = vmatmul.mubr.f32.gmra.mxu1 %v1644_v6 }
 0x2c1   : > { %v1645_v12 = vmax.f32 %v1367_v9, 0.0  ;;  %v1382_v14 = vadd.f32 %v2638_v11, %v3896_v39 }
 0x2c2   : > { %v1376_v15 = vpop.f32.mrf.mxu0 }
 0x2c3   : > { %v1377_v1 = vadd.f32 %v3896_v39, %v1376_v15  ;;  %2761 = vmatprep.mubr.f32.mxu1 %v1645_v12  ;;  %v1648_v18 = vmax.f32 %v1382_v14, 0.0 }
 0x2c4   : > { %v2641_v16 = vpop.f32.mrf.mxu0  ;;  %2762 = vmatmul.mubr.f32.gmra.mxu1 %v1646_v13 }
 0x2c5   : > { %v1647_v17 = vmax.f32 %v1377_v1, 0.0  ;;  %v1392_v19 = vadd.f32 %v2641_v16, %v3896_v39 }
 0x2c6   : > { %v1386_v20 = vpop.f32.mrf.mxu0 }
 0x2c7   : > { %v1387_v21 = vadd.f32 %v3896_v39, %v1386_v20  ;;  %2764 = vmatprep.mubr.f32.mxu1 %v1647_v17  ;;  %v1650_v24 = vmax.f32 %v1392_v19, 0.0 }
 0x2c8   : > { %v2644_v22 = vpop.f32.mrf.mxu0  ;;  %2765 = vmatmul.mubr.f32.gmra.mxu1 %v1648_v18 }
 0x2c9   : > { %v1649_v23 = vmax.f32 %v1387_v21, 0.0  ;;  %v1402_v25 = vadd.f32 %v2644_v22, %v3896_v39 }
 0x2ca   : > { %v1396_v26 = vpop.f32.mrf.mxu0 }
 0x2cb   : > { %v1397_v27 = vadd.f32 %v3896_v39, %v1396_v26  ;;  %2767 = vmatprep.mubr.f32.mxu1 %v1649_v23  ;;  %v1652_v30 = vmax.f32 %v1402_v25, 0.0 }
 0x2cc   : > { %v2647_v28 = vpop.f32.mrf.mxu0  ;;  %2768 = vmatmul.mubr.f32.gmra.mxu1 %v1650_v24 }
 0x2cd   : > { %v1651_v29 = vmax.f32 %v1397_v27, 0.0  ;;  %v1412_v31 = vadd.f32 %v2647_v28, %v3896_v39 }
 0x2ce   : > { %v1406_v32 = vpop.f32.mrf.mxu0 }
 0x2cf   : > { %v1407_v33 = vadd.f32 %v3896_v39, %v1406_v32  ;;  %2770 = vmatprep.mubr.f32.mxu1 %v1651_v29  ;;  %v1654_v36 = vmax.f32 %v1412_v31, 0.0 }
 0x2d0   : > { %v2650_v34 = vpop.f32.mrf.mxu0  ;;  %2771 = vmatmul.mubr.f32.gmra.mxu1 %v1652_v30 }
 0x2d1   : > { %v1653_v35 = vmax.f32 %v1407_v33, 0.0  ;;  %v1422_v37 = vadd.f32 %v2650_v34, %v3896_v39 }
 0x2d2   : > { %v1416_v38 = vpop.f32.mrf.mxu0 }
 0x2d3   : > { %v1417_v40 = vadd.f32 %v3896_v39, %v1416_v38  ;;  %2773 = vmatprep.mubr.f32.mxu1 %v1653_v35  ;;  %v1656_v43 = vmax.f32 %v1422_v37, 0.0 }
 0x2d4   : > { %v2653_v41 = vpop.f32.mrf.mxu0  ;;  %2774 = vmatmul.mubr.f32.gmra.mxu1 %v1654_v36 }
 0x2d5   : > { %v1655_v42 = vmax.f32 %v1417_v40, 0.0  ;;  %v1432_v44 = vadd.f32 %v2653_v41, %v3896_v39 }
 0x2d6   : > { %v1426_v10 = vpop.f32.mrf.mxu0 }
 0x2d7   : > { %v1427_v45 = vadd.f32 %v3896_v39, %v1426_v10  ;;  %2776 = vmatprep.mubr.f32.mxu1 %v1655_v42  ;;  %v1658_v48 = vmax.f32 %v1432_v44, 0.0 }
 0x2d8   : > { %v2656_v46 = vpop.f32.mrf.mxu0  ;;  %2777 = vmatmul.mubr.f32.gmra.mxu1 %v1656_v43 }
 0x2d9   : > { %v1657_v47 = vmax.f32 %v1427_v45, 0.0  ;;  %v1442_v49 = vadd.f32 %v2656_v46, %v3896_v39 }
 0x2da   : > { %v1436_v50 = vpop.f32.mrf.mxu0 }
 0x2db   : > { %v1437_v51 = vadd.f32 %v3896_v39, %v1436_v50  ;;  %2779 = vmatprep.mubr.f32.mxu1 %v1657_v47  ;;  %v1660_v54 = vmax.f32 %v1442_v49, 0.0 }
 0x2dc   : > { %v2659_v52 = vpop.f32.mrf.mxu0  ;;  %2780 = vmatmul.mubr.f32.gmra.mxu1 %v1658_v48 }
 0x2dd   : > { %v1659_v53 = vmax.f32 %v1437_v51, 0.0  ;;  %v1452_v55 = vadd.f32 %v2659_v52, %v3896_v39 }
 0x2de   : > { %v1446_v56 = vpop.f32.mrf.mxu0 }
 0x2df   : > { %v1447_v57 = vadd.f32 %v3896_v39, %v1446_v56  ;;  %2782 = vmatprep.mubr.f32.mxu1 %v1659_v53  ;;  %v1662_v60 = vmax.f32 %v1452_v55, 0.0 }
 0x2e0   : > { %v2662_v58 = vpop.f32.mrf.mxu0  ;;  %2783 = vmatmul.mubr.f32.gmra.mxu1 %v1660_v54 }
 0x2e1   : > { %v1661_v59 = vmax.f32 %v1447_v57, 0.0  ;;  %v1462_v61 = vadd.f32 %v2662_v58, %v3896_v39 }
 0x2e2   : > { %v1456_v62 = vpop.f32.mrf.mxu0 }
 0x2e3   : > { %v1457_v63 = vadd.f32 %v3896_v39, %v1456_v62  ;;  %2785 = vmatprep.mubr.f32.mxu1 %v1661_v59  ;;  %v1664_v3 = vmax.f32 %v1462_v61, 0.0 }
 0x2e4   : > { %v2665_v0 = vpop.f32.mrf.mxu0  ;;  %2786 = vmatmul.mubr.f32.gmra.mxu1 %v1662_v60 }
 0x2e5   : > { %v1663_v2 = vmax.f32 %v1457_v63, 0.0  ;;  %v1472_v4 = vadd.f32 %v2665_v0, %v3896_v39 }
 0x2e6   : > { %v1466_v5 = vpop.f32.mrf.mxu0 }
 0x2e7   : > { %v1467_v6 = vadd.f32 %v3896_v39, %v1466_v5  ;;  %2788 = vmatprep.mubr.f32.mxu1 %v1663_v2  ;;  %v1666_v9 = vmax.f32 %v1472_v4, 0.0 }
 0x2e8   : > { %v2668_v7 = vpop.f32.mrf.mxu0  ;;  %2789 = vmatmul.mubr.f32.gmra.mxu1 %v1664_v3 }
 0x2e9   : > { %v1665_v8 = vmax.f32 %v1467_v6, 0.0  ;;  %v1482_v11 = vadd.f32 %v2668_v7, %v3896_v39 }
 0x2ea   : > { %v1476_v12 = vpop.f32.mrf.mxu0 }
 0x2eb   : > { %v1477_v13 = vadd.f32 %v3896_v39, %v1476_v12  ;;  %2791 = vmatprep.mubr.f32.mxu1 %v1665_v8  ;;  %v1668_v1 = vmax.f32 %v1482_v11, 0.0 }
 0x2ec   : > { %v2671_v14 = vpop.f32.mrf.mxu0  ;;  %2792 = vmatmul.mubr.f32.gmra.mxu1 %v1666_v9 }
 0x2ed   : > { %v1667_v15 = vmax.f32 %v1477_v13, 0.0  ;;  %v1492_v16 = vadd.f32 %v2671_v14, %v3896_v39 }
 0x2ee   : > { %v1486_v17 = vpop.f32.mrf.mxu0 }
 0x2ef   : > { %v1487_v18 = vadd.f32 %v3896_v39, %v1486_v17  ;;  %2794 = vmatprep.mubr.f32.mxu1 %v1667_v15  ;;  %v1670_v21 = vmax.f32 %v1492_v16, 0.0 }
 0x2f0   : > { %v2674_v19 = vpop.f32.mrf.mxu0  ;;  %2795 = vmatmul.mubr.f32.gmra.mxu1 %v1668_v1 }
 0x2f1   : > { %v1669_v20 = vmax.f32 %v1487_v18, 0.0  ;;  %v1502_v22 = vadd.f32 %v2674_v19, %v3896_v39 }
 0x2f2   : > { %v1496_v23 = vpop.f32.mrf.mxu0 }
 0x2f3   : > { %v1497_v24 = vadd.f32 %v3896_v39, %v1496_v23  ;;  %2797 = vmatprep.mubr.f32.mxu1 %v1669_v20  ;;  %v1672_v27 = vmax.f32 %v1502_v22, 0.0 }
 0x2f4   : > { %v2677_v25 = vpop.f32.mrf.mxu0  ;;  %2798 = vmatmul.mubr.f32.gmra.mxu1 %v1670_v21 }
 0x2f5   : > { %v1671_v26 = vmax.f32 %v1497_v24, 0.0  ;;  %v1512_v28 = vadd.f32 %v2677_v25, %v3896_v39 }
 0x2f6   : > { %v1506_v29 = vpop.f32.mrf.mxu0 }
 0x2f7   : > { %v1507_v30 = vadd.f32 %v3896_v39, %v1506_v29  ;;  %2800 = vmatprep.mubr.f32.mxu1 %v1671_v26  ;;  %v1674_v33 = vmax.f32 %v1512_v28, 0.0 }
 0x2f8   : > { %v2680_v31 = vpop.f32.mrf.mxu0  ;;  %2801 = vmatmul.mubr.f32.gmra.mxu1 %v1672_v27 }
 0x2f9   : > { %v1673_v32 = vmax.f32 %v1507_v30, 0.0  ;;  %v1522_v34 = vadd.f32 %v2680_v31, %v3896_v39 }
 0x2fa   : > { %v1516_v35 = vpop.f32.mrf.mxu0 }
 0x2fb   : > { %v1517_v36 = vadd.f32 %v3896_v39, %v1516_v35  ;;  %2803 = vmatprep.mubr.f32.mxu1 %v1673_v32  ;;  %v1676_v40 = vmax.f32 %v1522_v34, 0.0 }
 0x2fc   : > { %v2683_v37 = vpop.f32.mrf.mxu0  ;;  %2804 = vmatmul.mubr.f32.gmra.mxu1 %v1674_v33 }
 0x2fd   : > { %v1675_v38 = vmax.f32 %v1517_v36, 0.0  ;;  %v1532_v41 = vadd.f32 %v2683_v37, %v3896_v39 }
 0x2fe   : > { %v1526_v42 = vpop.f32.mrf.mxu0 }
 0x2ff   : > { %v1527_v43 = vadd.f32 %v3896_v39, %v1526_v42  ;;  %2806 = vmatprep.mubr.f32.mxu1 %v1675_v38  ;;  %v1678_v45 = vmax.f32 %v1532_v41, 0.0 }
 0x300   : > { %v2686_v44 = vpop.f32.mrf.mxu0  ;;  %2807 = vmatmul.mubr.f32.gmra.mxu1 %v1676_v40 }
 0x301   : > { %v1677_v10 = vmax.f32 %v1527_v43, 0.0  ;;  %v1542_v46 = vadd.f32 %v2686_v44, %v3896_v39  ;;  %v3965_v43 = vld [vmem:[%s4291_s29] ss:$0 sm:$0xff] }
 0x302   : > { %v1536_v47 = vpop.f32.mrf.mxu0 }
 0x303   : > { %v1537_v48 = vadd.f32 %v3896_v39, %v1536_v47  ;;  %2809 = vmatprep.mubr.f32.mxu1 %v1677_v10  ;;  %v1680_v51 = vmax.f32 %v1542_v46, 0.0 }
 0x304   : > { %v2689_v49 = vpop.f32.mrf.mxu0  ;;  %2810 = vmatmul.mubr.f32.gmra.mxu1 %v1678_v45 }
 0x305   : > { %v1679_v50 = vmax.f32 %v1537_v48, 0.0  ;;  %v1552_v52 = vadd.f32 %v2689_v49, %v3896_v39  ;;  %v3010_v49 = vld [vmem:[%s3573_s21] sm:$0xff] }
 0x306   : > { %v1546_v53 = vpop.f32.mrf.mxu0 }
 0x307   : > { %v1547_v54 = vadd.f32 %v3896_v39, %v1546_v53  ;;  %2812 = vmatprep.mubr.f32.mxu1 %v1679_v50  ;;  %v1682_v57 = vmax.f32 %v1552_v52, 0.0  ;;  %v3011_v53 = vld [vmem:[%s3573_s21 + $0x18] sm:$0xff] }
 0x308   : > { %v2692_v55 = vpop.f32.mrf.mxu0  ;;  %2813 = vmatmul.mubr.f32.gmra.mxu1 %v1680_v51 }
 0x309   : > { %v1681_v56 = vmax.f32 %v1547_v54, 0.0  ;;  %v1562_v58 = vadd.f32 %v2692_v55, %v3896_v39 }
 0x30a   : > { %v1556_v59 = vpop.f32.mrf.mxu0 }
 0x30b   : > { %v1557_v60 = vadd.f32 %v3896_v39, %v1556_v59  ;;  %2815 = vmatprep.mubr.f32.mxu1 %v1681_v56  ;;  %v1684_v63 = vmax.f32 %v1562_v58, 0.0 }
 0x30c   : > { %v2695_v61 = vpop.f32.mrf.mxu0  ;;  %2816 = vmatmul.mubr.f32.gmra.mxu1 %v1682_v57  ;;  %v3012_v57 = vld [vmem:[%s3573_s21 + $0x10] sm:$0xff] }
 0x30d   : > { %v1683_v62 = vmax.f32 %v1557_v60, 0.0  ;;  %v1572_v0 = vadd.f32 %v2695_v61, %v3896_v39  ;;  %v3013_v61 = vld [vmem:[%s3573_s21 + $0x28] sm:$0xff] }
 0x30e   : > { %v1566_v2 = vpop.f32.mrf.mxu0 }
 0x30f   : > { %v1567_v3 = vadd.f32 %v3896_v39, %v1566_v2  ;;  %2818 = vmatprep.mubr.f32.mxu1 %v1683_v62  ;;  %v1686_v6 = vmax.f32 %v1572_v0, 0.0  ;;  %v3014_v2 = vld [vmem:[%s3573_s21 + $0x20] sm:$0xff] }
 0x310   : > { %v2698_v4 = vpop.f32.mrf.mxu0  ;;  %2819 = vmatmul.mubr.f32.gmra.mxu1 %v1684_v63 }
 0x311   : > { %v1685_v5 = vmax.f32 %v1567_v3, 0.0  ;;  %v1582_v7 = vadd.f32 %v2698_v4, %v3896_v39 }
 0x312   : > { %v1576_v8 = vpop.f32.mrf.mxu0 }
 0x313   : > { %v1577_v9 = vadd.f32 %v3896_v39, %v1576_v8  ;;  %2821 = vmatprep.mubr.f32.mxu1 %v1685_v5  ;;  %v1688_v13 = vmax.f32 %v1582_v7, 0.0 }
 0x314   : > { %v2701_v11 = vpop.f32.mrf.mxu0  ;;  %2822 = vmatmul.mubr.f32.gmra.mxu1 %v1686_v6  ;;  %v3015_v6 = vld [vmem:[%s3573_s21 + $0x38] sm:$0xff] }
 0x315   : > { %v1687_v12 = vmax.f32 %v1577_v9, 0.0  ;;  %v1592_v14 = vadd.f32 %v2701_v11, %v3896_v39  ;;  %v3016_v11 = vld [vmem:[%s3573_s21 + $0x30] sm:$0xff] }
 0x316   : > { %v1586_v15 = vpop.f32.mrf.mxu0 }
 0x317   : > { %v1587_v1 = vadd.f32 %v3896_v39, %v1586_v15  ;;  %2824 = vmatprep.mubr.f32.mxu1 %v1687_v12  ;;  %v1690_v18 = vmax.f32 %v1592_v14, 0.0  ;;  %v3017_v15 = vld [vmem:[%s3573_s21 + $0x48] sm:$0xff] }
 0x318   : > { %v2704_v16 = vpop.f32.mrf.mxu0  ;;  %2825 = vmatmul.mubr.f32.gmra.mxu1 %v1688_v13 }
 0x319   : > { %v1689_v17 = vmax.f32 %v1587_v1, 0.0  ;;  %v1602_v19 = vadd.f32 %v2704_v16, %v3896_v39 }
 0x31a   : > { %v1596_v20 = vpop.f32.mrf.mxu0 }
 0x31b   : > { %v1597_v21 = vadd.f32 %v3896_v39, %v1596_v20  ;;  %2827 = vmatprep.mubr.f32.mxu1 %v1689_v17  ;;  %v1692_v24 = vmax.f32 %v1602_v19, 0.0 }
 0x31c   : > { %v2707_v22 = vpop.f32.mrf.mxu0  ;;  %2828 = vmatmul.mubr.f32.gmra.mxu1 %v1690_v18  ;;  %v3018_v18 = vld [vmem:[%s3573_s21 + $0x40] sm:$0xff] }
 0x31d   : > { %v1691_v23 = vmax.f32 %v1597_v21, 0.0  ;;  %v1612_v25 = vadd.f32 %v2707_v22, %v3896_v39  ;;  %v3019_v22 = vld [vmem:[%s3573_s21 + $0x58] sm:$0xff] }
 0x31e   : > { %v1606_v26 = vpop.f32.mrf.mxu0 }
 0x31f   : > { %v1607_v27 = vadd.f32 %v3896_v39, %v1606_v26  ;;  %2830 = vmatprep.mubr.f32.mxu1 %v1691_v23  ;;  %v1694_v30 = vmax.f32 %v1612_v25, 0.0  ;;  %v3020_v26 = vld [vmem:[%s3573_s21 + $0x50] sm:$0xff] }
 0x320   : > { %v2710_v28 = vpop.f32.mrf.mxu0  ;;  %2831 = vmatmul.mubr.f32.gmra.mxu1 %v1692_v24 }
 0x321   : > { %v1693_v29 = vmax.f32 %v1607_v27, 0.0  ;;  %v1622_v31 = vadd.f32 %v2710_v28, %v3896_v39 }
 0x322   : > { %v1616_v32 = vpop.f32.mrf.mxu0 }
 0x323   : > { %v1617_v33 = vadd.f32 %v3896_v39, %v1616_v32  ;;  %2833 = vmatprep.mubr.f32.mxu1 %v1693_v29  ;;  %v1696_v36 = vmax.f32 %v1622_v31, 0.0 }
 0x324   : > { %v2713_v34 = vpop.f32.mrf.mxu0  ;;  %2834 = vmatmul.mubr.f32.gmra.mxu1 %v1694_v30  ;;  %v3021_v30 = vld [vmem:[%s3573_s21 + $0x68] sm:$0xff] }
 0x325   : > { %v1695_v35 = vmax.f32 %v1617_v33, 0.0  ;;  %v1632_v37 = vadd.f32 %v2713_v34, %v3896_v39  ;;  %v3022_v34 = vld [vmem:[%s3573_s21 + $0x60] sm:$0xff] }
 0x326   : > { %v1626_v38 = vpop.f32.mrf.mxu0 }
 0x327   : > { %v1627_v40 = vadd.f32 %v3896_v39, %v1626_v38  ;;  %2836 = vmatprep.mubr.f32.mxu1 %v1695_v35  ;;  %v1698_v42 = vmax.f32 %v1632_v37, 0.0  ;;  %v3009_v39 = vld [vmem:[%s3573_s21 + $0x8] sm:$0xff]  ;;  %v3023_v38 = vld [vmem:[%s3573_s21 + $0x78] sm:$0xff] }
 0x328   : > { %2837 = vmatmul.mubr.f32.gmra.mxu1 %v1696_v36 }
 0x329   : > { %v1697_v41 = vmax.f32 %v1627_v40, 0.0 }
 0x32b   : > { %2839 = vmatprep.mubr.f32.mxu1 %v1697_v41 }
 0x32c   : > { %2840 = vmatmul.mubr.f32.gmra.mxu1 %v1698_v42 }
 0x370   : > { %v2748_v44 = vpop.f32.mrf.mxu1 }
 0x371   : > { %v1794_v10 = vadd.f32 %v2748_v44, %v3965_v43  ;;  %v3024_v44 = vld [vmem:[%s3573_s21 + $0x70] sm:$0xff] }
 0x372   : > { %v1788_v45 = vpop.f32.mrf.mxu1 }
 0x373   : > { %v2108_v46 = vadd.f32 %v3009_v39, %v1794_v10  ;;  %v1789_v47 = vadd.f32 %v3965_v43, %v1788_v45 }
 0x374   : > { %v2751_v48 = vpop.f32.mrf.mxu1 }
 0x375   : > { %2172 = vst [vmem:[%s3595_s16 + $0x8] sm:$0xff] %v2108_v46  ;;  %v2107_v50 = vadd.f32 %v3010_v49, %v1789_v47  ;;  %v1804_v51 = vadd.f32 %v2751_v48, %v3965_v43  ;;  %v3025_v46 = vld [vmem:[%s3573_s21 + $0x88] sm:$0xff] }
 0x376   : > { %v1798_v52 = vpop.f32.mrf.mxu1 }
 0x377   : > { %2171 = vst [vmem:[%s3595_s16] sm:$0xff] %v2107_v50  ;;  %v2110_v54 = vadd.f32 %v3011_v53, %v1804_v51  ;;  %v1799_v55 = vadd.f32 %v3965_v43, %v1798_v52  ;;  %v3026_v50 = vld [vmem:[%s3573_s21 + $0x80] sm:$0xff] }
 0x378   : > { %v2754_v56 = vpop.f32.mrf.mxu1 }
 0x379   : > { %2174 = vst [vmem:[%s3595_s16 + $0x18] sm:$0xff] %v2110_v54  ;;  %v2109_v58 = vadd.f32 %v3012_v57, %v1799_v55  ;;  %v1814_v59 = vadd.f32 %v2754_v56, %v3965_v43  ;;  %v3027_v54 = vld [vmem:[%s3573_s21 + $0x98] sm:$0xff] }
 0x37a   : > { %v1808_v60 = vpop.f32.mrf.mxu1 }
 0x37b   : > { %2173 = vst [vmem:[%s3595_s16 + $0x10] sm:$0xff] %v2109_v58  ;;  %v2112_v62 = vadd.f32 %v3013_v61, %v1814_v59  ;;  %v1809_v63 = vadd.f32 %v3965_v43, %v1808_v60  ;;  %v3028_v58 = vld [vmem:[%s3573_s21 + $0x90] sm:$0xff] }
 0x37c   : > { %v2757_v0 = vpop.f32.mrf.mxu1 }
 0x37d   : > { %2176 = vst [vmem:[%s3595_s16 + $0x28] sm:$0xff] %v2112_v62  ;;  %v2111_v3 = vadd.f32 %v3014_v2, %v1809_v63  ;;  %v1824_v4 = vadd.f32 %v2757_v0, %v3965_v43  ;;  %v3029_v62 = vld [vmem:[%s3573_s21 + $0xa8] sm:$0xff] }
 0x37e   : > { %v1818_v5 = vpop.f32.mrf.mxu1 }
 0x37f   : > { %2175 = vst [vmem:[%s3595_s16 + $0x20] sm:$0xff] %v2111_v3  ;;  %v2114_v7 = vadd.f32 %v3015_v6, %v1824_v4  ;;  %v1819_v8 = vadd.f32 %v3965_v43, %v1818_v5  ;;  %v3030_v3 = vld [vmem:[%s3573_s21 + $0xa0] sm:$0xff] }
 0x380   : > { %v2760_v9 = vpop.f32.mrf.mxu1 }
 0x381   : > { %2178 = vst [vmem:[%s3595_s16 + $0x38] sm:$0xff] %v2114_v7  ;;  %v2113_v12 = vadd.f32 %v3016_v11, %v1819_v8  ;;  %v1834_v13 = vadd.f32 %v2760_v9, %v3965_v43  ;;  %v3031_v7 = vld [vmem:[%s3573_s21 + $0xb8] sm:$0xff] }
 0x382   : > { %v1828_v14 = vpop.f32.mrf.mxu1 }
 0x383   : > { %2177 = vst [vmem:[%s3595_s16 + $0x30] sm:$0xff] %v2113_v12  ;;  %v2116_v1 = vadd.f32 %v3017_v15, %v1834_v13  ;;  %v1829_v16 = vadd.f32 %v3965_v43, %v1828_v14  ;;  %v3032_v12 = vld [vmem:[%s3573_s21 + $0xb0] sm:$0xff] }
 0x384   : > { %v2763_v17 = vpop.f32.mrf.mxu1 }
 0x385   : > { %2180 = vst [vmem:[%s3595_s16 + $0x48] sm:$0xff] %v2116_v1  ;;  %v2115_v19 = vadd.f32 %v3018_v18, %v1829_v16  ;;  %v1844_v20 = vadd.f32 %v2763_v17, %v3965_v43  ;;  %v3033_v1 = vld [vmem:[%s3573_s21 + $0xc8] sm:$0xff] }
 0x386   : > { %v1838_v21 = vpop.f32.mrf.mxu1 }
 0x387   : > { %2179 = vst [vmem:[%s3595_s16 + $0x40] sm:$0xff] %v2115_v19  ;;  %v2118_v23 = vadd.f32 %v3019_v22, %v1844_v20  ;;  %v1839_v24 = vadd.f32 %v3965_v43, %v1838_v21  ;;  %v3034_v19 = vld [vmem:[%s3573_s21 + $0xc0] sm:$0xff] }
 0x388   : > { %v2766_v25 = vpop.f32.mrf.mxu1 }
 0x389   : > { %2182 = vst [vmem:[%s3595_s16 + $0x58] sm:$0xff] %v2118_v23  ;;  %v2117_v27 = vadd.f32 %v3020_v26, %v1839_v24  ;;  %v1854_v28 = vadd.f32 %v2766_v25, %v3965_v43  ;;  %v3035_v23 = vld [vmem:[%s3573_s21 + $0xd8] sm:$0xff] }
 0x38a   : > { %v1848_v29 = vpop.f32.mrf.mxu1 }
 0x38b   : > { %2181 = vst [vmem:[%s3595_s16 + $0x50] sm:$0xff] %v2117_v27  ;;  %v2120_v31 = vadd.f32 %v3021_v30, %v1854_v28  ;;  %v1849_v32 = vadd.f32 %v3965_v43, %v1848_v29  ;;  %v3036_v27 = vld [vmem:[%s3573_s21 + $0xd0] sm:$0xff] }
 0x38c   : > { %v2769_v33 = vpop.f32.mrf.mxu1 }
 0x38d   : > { %2184 = vst [vmem:[%s3595_s16 + $0x68] sm:$0xff] %v2120_v31  ;;  %v2119_v35 = vadd.f32 %v3022_v34, %v1849_v32  ;;  %v1864_v36 = vadd.f32 %v2769_v33, %v3965_v43  ;;  %v3037_v31 = vld [vmem:[%s3573_s21 + $0xe8] sm:$0xff] }
 0x38e   : > { %v1858_v37 = vpop.f32.mrf.mxu1 }
 0x38f   : > { %2183 = vst [vmem:[%s3595_s16 + $0x60] sm:$0xff] %v2119_v35  ;;  %v2122_v40 = vadd.f32 %v3023_v38, %v1864_v36  ;;  %v1859_v41 = vadd.f32 %v3965_v43, %v1858_v37  ;;  %v3038_v35 = vld [vmem:[%s3573_s21 + $0xe0] sm:$0xff] }
 0x390   : > { %v2772_v42 = vpop.f32.mrf.mxu1 }
 0x391   : > { %2186 = vst [vmem:[%s3595_s16 + $0x78] sm:$0xff] %v2122_v40  ;;  %v2121_v10 = vadd.f32 %v3024_v44, %v1859_v41  ;;  %v1874_v45 = vadd.f32 %v2772_v42, %v3965_v43  ;;  %v3039_v40 = vld [vmem:[%s3573_s21 + $0xf8] sm:$0xff] }
 0x392   : > { %v1868_v39 = vpop.f32.mrf.mxu1 }
 0x393   : > { %2185 = vst [vmem:[%s3595_s16 + $0x70] sm:$0xff] %v2121_v10  ;;  %v2124_v47 = vadd.f32 %v3025_v46, %v1874_v45  ;;  %v1869_v48 = vadd.f32 %v3965_v43, %v1868_v39  ;;  %v3040_v10 = vld [vmem:[%s3573_s21 + $0xf0] sm:$0xff] }
 0x394   : > { %v2775_v49 = vpop.f32.mrf.mxu1 }
 0x395   : > { %2188 = vst [vmem:[%s3595_s16 + $0x88] sm:$0xff] %v2124_v47  ;;  %v2123_v51 = vadd.f32 %v3026_v50, %v1869_v48  ;;  %v1884_v52 = vadd.f32 %v2775_v49, %v3965_v43  ;;  %v3041_v47 = vld [vmem:[%s3573_s21 + $0x108] sm:$0xff] }
 0x396   : > { %v1878_v53 = vpop.f32.mrf.mxu1 }
 0x397   : > { %2187 = vst [vmem:[%s3595_s16 + $0x80] sm:$0xff] %v2123_v51  ;;  %v2126_v55 = vadd.f32 %v3027_v54, %v1884_v52  ;;  %v1879_v56 = vadd.f32 %v3965_v43, %v1878_v53  ;;  %v3042_v51 = vld [vmem:[%s3573_s21 + $0x100] sm:$0xff] }
 0x398   : > { %v2778_v57 = vpop.f32.mrf.mxu1 }
 0x399   : > { %2190 = vst [vmem:[%s3595_s16 + $0x98] sm:$0xff] %v2126_v55  ;;  %v2125_v59 = vadd.f32 %v3028_v58, %v1879_v56  ;;  %v1894_v60 = vadd.f32 %v2778_v57, %v3965_v43  ;;  %v3043_v55 = vld [vmem:[%s3573_s21 + $0x118] sm:$0xff] }
 0x39a   : > { %v1888_v61 = vpop.f32.mrf.mxu1 }
 0x39b   : > { %2189 = vst [vmem:[%s3595_s16 + $0x90] sm:$0xff] %v2125_v59  ;;  %v2128_v63 = vadd.f32 %v3029_v62, %v1894_v60  ;;  %v1889_v0 = vadd.f32 %v3965_v43, %v1888_v61  ;;  %v3044_v59 = vld [vmem:[%s3573_s21 + $0x110] sm:$0xff] }
 0x39c   : > { %v2781_v2 = vpop.f32.mrf.mxu1 }
 0x39d   : > { %2192 = vst [vmem:[%s3595_s16 + $0xa8] sm:$0xff] %v2128_v63  ;;  %v2127_v4 = vadd.f32 %v3030_v3, %v1889_v0  ;;  %v1904_v5 = vadd.f32 %v2781_v2, %v3965_v43  ;;  %v3045_v63 = vld [vmem:[%s3573_s21 + $0x128] sm:$0xff] }
 0x39e   : > { %v1898_v6 = vpop.f32.mrf.mxu1 }
 0x39f   : > { %2191 = vst [vmem:[%s3595_s16 + $0xa0] sm:$0xff] %v2127_v4  ;;  %v2130_v8 = vadd.f32 %v3031_v7, %v1904_v5  ;;  %v1899_v9 = vadd.f32 %v3965_v43, %v1898_v6  ;;  %v3046_v4 = vld [vmem:[%s3573_s21 + $0x120] sm:$0xff] }
 0x3a0   : > { %v2784_v11 = vpop.f32.mrf.mxu1 }
 0x3a1   : > { %2194 = vst [vmem:[%s3595_s16 + $0xb8] sm:$0xff] %v2130_v8  ;;  %v2129_v13 = vadd.f32 %v3032_v12, %v1899_v9  ;;  %v1914_v14 = vadd.f32 %v2784_v11, %v3965_v43  ;;  %v3047_v8 = vld [vmem:[%s3573_s21 + $0x138] sm:$0xff] }
 0x3a2   : > { %v1908_v15 = vpop.f32.mrf.mxu1 }
 0x3a3   : > { %2193 = vst [vmem:[%s3595_s16 + $0xb0] sm:$0xff] %v2129_v13  ;;  %v2132_v16 = vadd.f32 %v3033_v1, %v1914_v14  ;;  %v1909_v17 = vadd.f32 %v3965_v43, %v1908_v15  ;;  %v3048_v13 = vld [vmem:[%s3573_s21 + $0x130] sm:$0xff] }
 0x3a4   : > { %v2787_v18 = vpop.f32.mrf.mxu1 }
 0x3a5   : > { %2196 = vst [vmem:[%s3595_s16 + $0xc8] sm:$0xff] %v2132_v16  ;;  %v2131_v20 = vadd.f32 %v3034_v19, %v1909_v17  ;;  %v1924_v21 = vadd.f32 %v2787_v18, %v3965_v43  ;;  %v3049_v16 = vld [vmem:[%s3573_s21 + $0x148] sm:$0xff] }
 0x3a6   : > { %v1918_v22 = vpop.f32.mrf.mxu1 }
 0x3a7   : > { %2195 = vst [vmem:[%s3595_s16 + $0xc0] sm:$0xff] %v2131_v20  ;;  %v2134_v24 = vadd.f32 %v3035_v23, %v1924_v21  ;;  %v1919_v25 = vadd.f32 %v3965_v43, %v1918_v22  ;;  %v3050_v20 = vld [vmem:[%s3573_s21 + $0x140] sm:$0xff] }
 0x3a8   : > { %v2790_v26 = vpop.f32.mrf.mxu1 }
 0x3a9   : > { %2198 = vst [vmem:[%s3595_s16 + $0xd8] sm:$0xff] %v2134_v24  ;;  %v2133_v28 = vadd.f32 %v3036_v27, %v1919_v25  ;;  %v1934_v29 = vadd.f32 %v2790_v26, %v3965_v43  ;;  %v3051_v24 = vld [vmem:[%s3573_s21 + $0x158] sm:$0xff] }
 0x3aa   : > { %v1928_v30 = vpop.f32.mrf.mxu1 }
 0x3ab   : > { %2197 = vst [vmem:[%s3595_s16 + $0xd0] sm:$0xff] %v2133_v28  ;;  %v2136_v32 = vadd.f32 %v3037_v31, %v1934_v29  ;;  %v1929_v33 = vadd.f32 %v3965_v43, %v1928_v30  ;;  %v3052_v28 = vld [vmem:[%s3573_s21 + $0x150] sm:$0xff] }
 0x3ac   : > { %v2793_v34 = vpop.f32.mrf.mxu1 }
 0x3ad   : > { %2200 = vst [vmem:[%s3595_s16 + $0xe8] sm:$0xff] %v2136_v32  ;;  %v2135_v36 = vadd.f32 %v3038_v35, %v1929_v33  ;;  %v1944_v37 = vadd.f32 %v2793_v34, %v3965_v43  ;;  %v3053_v32 = vld [vmem:[%s3573_s21 + $0x168] sm:$0xff] }
 0x3ae   : > { %v1938_v38 = vpop.f32.mrf.mxu1 }
 0x3af   : > { %2199 = vst [vmem:[%s3595_s16 + $0xe0] sm:$0xff] %v2135_v36  ;;  %v2138_v41 = vadd.f32 %v3039_v40, %v1944_v37  ;;  %v1939_v42 = vadd.f32 %v3965_v43, %v1938_v38  ;;  %v3054_v36 = vld [vmem:[%s3573_s21 + $0x160] sm:$0xff] }
 0x3b0   : > { %v2796_v44 = vpop.f32.mrf.mxu1 }
 0x3b1   : > { %2202 = vst [vmem:[%s3595_s16 + $0xf8] sm:$0xff] %v2138_v41  ;;  %v2137_v45 = vadd.f32 %v3040_v10, %v1939_v42  ;;  %v1954_v39 = vadd.f32 %v2796_v44, %v3965_v43  ;;  %v3055_v41 = vld [vmem:[%s3573_s21 + $0x178] sm:$0xff] }
 0x3b2   : > { %v1948_v46 = vpop.f32.mrf.mxu1 }
 0x3b3   : > { %2201 = vst [vmem:[%s3595_s16 + $0xf0] sm:$0xff] %v2137_v45  ;;  %v2140_v48 = vadd.f32 %v3041_v47, %v1954_v39  ;;  %v1949_v49 = vadd.f32 %v3965_v43, %v1948_v46  ;;  %v3056_v45 = vld [vmem:[%s3573_s21 + $0x170] sm:$0xff] }
 0x3b4   : > { %v2799_v50 = vpop.f32.mrf.mxu1 }
 0x3b5   : > { %2204 = vst [vmem:[%s3595_s16 + $0x108] sm:$0xff] %v2140_v48  ;;  %v2139_v52 = vadd.f32 %v3042_v51, %v1949_v49  ;;  %v1964_v53 = vadd.f32 %v2799_v50, %v3965_v43  ;;  %v3057_v48 = vld [vmem:[%s3573_s21 + $0x188] sm:$0xff] }
 0x3b6   : > { %v1958_v54 = vpop.f32.mrf.mxu1 }
 0x3b7   : > { %2203 = vst [vmem:[%s3595_s16 + $0x100] sm:$0xff] %v2139_v52  ;;  %v2142_v56 = vadd.f32 %v3043_v55, %v1964_v53  ;;  %v1959_v57 = vadd.f32 %v3965_v43, %v1958_v54  ;;  %v3058_v52 = vld [vmem:[%s3573_s21 + $0x180] sm:$0xff] }
 0x3b8   : > { %v2802_v58 = vpop.f32.mrf.mxu1 }
 0x3b9   : > { %2206 = vst [vmem:[%s3595_s16 + $0x118] sm:$0xff] %v2142_v56  ;;  %v2141_v60 = vadd.f32 %v3044_v59, %v1959_v57  ;;  %v1974_v61 = vadd.f32 %v2802_v58, %v3965_v43  ;;  %v3059_v56 = vld [vmem:[%s3573_s21 + $0x198] sm:$0xff] }
 0x3ba   : > { %v1968_v62 = vpop.f32.mrf.mxu1 }
 0x3bb   : > { %2205 = vst [vmem:[%s3595_s16 + $0x110] sm:$0xff] %v2141_v60  ;;  %v2144_v0 = vadd.f32 %v3045_v63, %v1974_v61  ;;  %v1969_v2 = vadd.f32 %v3965_v43, %v1968_v62  ;;  %v3060_v60 = vld [vmem:[%s3573_s21 + $0x190] sm:$0xff] }
 0x3bc   : > { %v2805_v3 = vpop.f32.mrf.mxu1 }
 0x3bd   : > { %2208 = vst [vmem:[%s3595_s16 + $0x128] sm:$0xff] %v2144_v0  ;;  %v2143_v5 = vadd.f32 %v3046_v4, %v1969_v2  ;;  %v1984_v6 = vadd.f32 %v2805_v3, %v3965_v43  ;;  %v3061_v0 = vld [vmem:[%s3573_s21 + $0x1a8] sm:$0xff] }
 0x3be   : > { %v1978_v7 = vpop.f32.mrf.mxu1 }
 0x3bf   : > { %2207 = vst [vmem:[%s3595_s16 + $0x120] sm:$0xff] %v2143_v5  ;;  %v2146_v9 = vadd.f32 %v3047_v8, %v1984_v6  ;;  %v1979_v11 = vadd.f32 %v3965_v43, %v1978_v7  ;;  %v3062_v5 = vld [vmem:[%s3573_s21 + $0x1a0] sm:$0xff] }
 0x3c0   : > { %v2808_v12 = vpop.f32.mrf.mxu1 }
 0x3c1   : > { %2210 = vst [vmem:[%s3595_s16 + $0x138] sm:$0xff] %v2146_v9  ;;  %v2145_v14 = vadd.f32 %v3048_v13, %v1979_v11  ;;  %v1994_v15 = vadd.f32 %v2808_v12, %v3965_v43  ;;  %v3063_v9 = vld [vmem:[%s3573_s21 + $0x1b8] sm:$0xff] }
 0x3c2   : > { %v1988_v1 = vpop.f32.mrf.mxu1 }
 0x3c3   : > { %2209 = vst [vmem:[%s3595_s16 + $0x130] sm:$0xff] %v2145_v14  ;;  %v2148_v17 = vadd.f32 %v3049_v16, %v1994_v15  ;;  %v1989_v18 = vadd.f32 %v3965_v43, %v1988_v1  ;;  %v3064_v14 = vld [vmem:[%s3573_s21 + $0x1b0] sm:$0xff] }
 0x3c4   : > { %v2811_v19 = vpop.f32.mrf.mxu1 }
 0x3c5   : > { %2212 = vst [vmem:[%s3595_s16 + $0x148] sm:$0xff] %v2148_v17  ;;  %v2147_v21 = vadd.f32 %v3050_v20, %v1989_v18  ;;  %v2004_v22 = vadd.f32 %v2811_v19, %v3965_v43  ;;  %v3065_v17 = vld [vmem:[%s3573_s21 + $0x1c8] sm:$0xff] }
 0x3c6   : > { %v1998_v23 = vpop.f32.mrf.mxu1 }
 0x3c7   : > { %2211 = vst [vmem:[%s3595_s16 + $0x140] sm:$0xff] %v2147_v21  ;;  %v2150_v25 = vadd.f32 %v3051_v24, %v2004_v22  ;;  %v1999_v26 = vadd.f32 %v3965_v43, %v1998_v23  ;;  %v3066_v21 = vld [vmem:[%s3573_s21 + $0x1c0] sm:$0xff] }
 0x3c8   : > { %v2814_v27 = vpop.f32.mrf.mxu1 }
 0x3c9   : > { %2214 = vst [vmem:[%s3595_s16 + $0x158] sm:$0xff] %v2150_v25  ;;  %v2149_v29 = vadd.f32 %v3052_v28, %v1999_v26  ;;  %v2014_v30 = vadd.f32 %v2814_v27, %v3965_v43  ;;  %v3067_v25 = vld [vmem:[%s3573_s21 + $0x1d8] sm:$0xff] }
 0x3ca   : > { %v2008_v31 = vpop.f32.mrf.mxu1 }
 0x3cb   : > { %2213 = vst [vmem:[%s3595_s16 + $0x150] sm:$0xff] %v2149_v29  ;;  %v2152_v33 = vadd.f32 %v3053_v32, %v2014_v30  ;;  %v2009_v34 = vadd.f32 %v3965_v43, %v2008_v31  ;;  %v3068_v29 = vld [vmem:[%s3573_s21 + $0x1d0] sm:$0xff] }
 0x3cc   : > { %v2817_v35 = vpop.f32.mrf.mxu1 }
 0x3cd   : > { %2216 = vst [vmem:[%s3595_s16 + $0x168] sm:$0xff] %v2152_v33  ;;  %v2151_v37 = vadd.f32 %v3054_v36, %v2009_v34  ;;  %v2024_v38 = vadd.f32 %v2817_v35, %v3965_v43  ;;  %v3069_v33 = vld [vmem:[%s3573_s21 + $0x1e8] sm:$0xff] }
 0x3ce   : > { %v2018_v40 = vpop.f32.mrf.mxu1 }
 0x3cf   : > { %2215 = vst [vmem:[%s3595_s16 + $0x160] sm:$0xff] %v2151_v37  ;;  %v2154_v42 = vadd.f32 %v3055_v41, %v2024_v38  ;;  %v2019_v44 = vadd.f32 %v3965_v43, %v2018_v40  ;;  %v3070_v37 = vld [vmem:[%s3573_s21 + $0x1e0] sm:$0xff] }
 0x3d0   : > { %v2820_v10 = vpop.f32.mrf.mxu1 }
 0x3d1   : > { %2218 = vst [vmem:[%s3595_s16 + $0x178] sm:$0xff] %v2154_v42  ;;  %v2153_v39 = vadd.f32 %v3056_v45, %v2019_v44  ;;  %v2034_v46 = vadd.f32 %v2820_v10, %v3965_v43  ;;  %v3071_v42 = vld [vmem:[%s3573_s21 + $0x1f8] sm:$0xff]  ;;  %v3072_v45 = vld [vmem:[%s3573_s21 + $0x1f0] sm:$0xff] }
 0x3d2   : > { %v2028_v47 = vpop.f32.mrf.mxu1 }
 0x3d3   : > { %2217 = vst [vmem:[%s3595_s16 + $0x170] sm:$0xff] %v2153_v39  ;;  %v2156_v49 = vadd.f32 %v3057_v48, %v2034_v46  ;;  %v2029_v50 = vadd.f32 %v3965_v43, %v2028_v47 }
 0x3d4   : > { %v2823_v51 = vpop.f32.mrf.mxu1 }
 0x3d5   : > { %2220 = vst [vmem:[%s3595_s16 + $0x188] sm:$0xff] %v2156_v49  ;;  %v2155_v53 = vadd.f32 %v3058_v52, %v2029_v50  ;;  %v2044_v54 = vadd.f32 %v2823_v51, %v3965_v43 }
 0x3d6   : > { %v2038_v55 = vpop.f32.mrf.mxu1 }
 0x3d7   : > { %2219 = vst [vmem:[%s3595_s16 + $0x180] sm:$0xff] %v2155_v53  ;;  %v2158_v57 = vadd.f32 %v3059_v56, %v2044_v54  ;;  %v2039_v58 = vadd.f32 %v3965_v43, %v2038_v55 }
 0x3d8   : > { %v2826_v59 = vpop.f32.mrf.mxu1 }
 0x3d9   : > { %2222 = vst [vmem:[%s3595_s16 + $0x198] sm:$0xff] %v2158_v57  ;;  %v2157_v61 = vadd.f32 %v3060_v60, %v2039_v58  ;;  %v2054_v62 = vadd.f32 %v2826_v59, %v3965_v43 }
 0x3da   : > { %v2048_v63 = vpop.f32.mrf.mxu1 }
 0x3db   : > { %2221 = vst [vmem:[%s3595_s16 + $0x190] sm:$0xff] %v2157_v61  ;;  %v2160_v2 = vadd.f32 %v3061_v0, %v2054_v62  ;;  %v2049_v3 = vadd.f32 %v3965_v43, %v2048_v63 }
 0x3dc   : > { %v2829_v4 = vpop.f32.mrf.mxu1 }
 0x3dd   : > { %2224 = vst [vmem:[%s3595_s16 + $0x1a8] sm:$0xff] %v2160_v2  ;;  %v2159_v6 = vadd.f32 %v3062_v5, %v2049_v3  ;;  %v2064_v7 = vadd.f32 %v2829_v4, %v3965_v43 }
 0x3de   : > { %v2058_v8 = vpop.f32.mrf.mxu1 }
 0x3df   : > { %2223 = vst [vmem:[%s3595_s16 + $0x1a0] sm:$0xff] %v2159_v6  ;;  %v2162_v11 = vadd.f32 %v3063_v9, %v2064_v7  ;;  %v2059_v12 = vadd.f32 %v3965_v43, %v2058_v8 }
 0x3e0   : > { %v2832_v13 = vpop.f32.mrf.mxu1 }
 0x3e1   : > { %2226 = vst [vmem:[%s3595_s16 + $0x1b8] sm:$0xff] %v2162_v11  ;;  %v2161_v15 = vadd.f32 %v3064_v14, %v2059_v12  ;;  %v2074_v1 = vadd.f32 %v2832_v13, %v3965_v43 }
 0x3e2   : > { %v2068_v16 = vpop.f32.mrf.mxu1 }
 0x3e3   : > { %2225 = vst [vmem:[%s3595_s16 + $0x1b0] sm:$0xff] %v2161_v15  ;;  %v2164_v18 = vadd.f32 %v3065_v17, %v2074_v1  ;;  %v2069_v19 = vadd.f32 %v3965_v43, %v2068_v16 }
 0x3e4   : > { %v2835_v20 = vpop.f32.mrf.mxu1 }
 0x3e5   : > { %2228 = vst [vmem:[%s3595_s16 + $0x1c8] sm:$0xff] %v2164_v18  ;;  %v2163_v22 = vadd.f32 %v3066_v21, %v2069_v19  ;;  %v2084_v23 = vadd.f32 %v2835_v20, %v3965_v43 }
 0x3e6   : > { %v2078_v24 = vpop.f32.mrf.mxu1 }
 0x3e7   : > { %2227 = vst [vmem:[%s3595_s16 + $0x1c0] sm:$0xff] %v2163_v22  ;;  %v2166_v26 = vadd.f32 %v3067_v25, %v2084_v23  ;;  %v2079_v27 = vadd.f32 %v3965_v43, %v2078_v24 }
 0x3e8   : > { %v2838_v28 = vpop.f32.mrf.mxu1 }
 0x3e9   : > { %2230 = vst [vmem:[%s3595_s16 + $0x1d8] sm:$0xff] %v2166_v26  ;;  %v2165_v30 = vadd.f32 %v3068_v29, %v2079_v27  ;;  %v2094_v31 = vadd.f32 %v2838_v28, %v3965_v43 }
 0x3ea   : > { %v2088_v32 = vpop.f32.mrf.mxu1 }
 0x3eb   : > { %2229 = vst [vmem:[%s3595_s16 + $0x1d0] sm:$0xff] %v2165_v30  ;;  %v2168_v34 = vadd.f32 %v3069_v33, %v2094_v31  ;;  %v2089_v35 = vadd.f32 %v3965_v43, %v2088_v32 }
 0x3ec   : > { %v2841_v36 = vpop.f32.mrf.mxu1 }
 0x3ed   : > { %2232 = vst [vmem:[%s3595_s16 + $0x1e8] sm:$0xff] %v2168_v34  ;;  %v2167_v38 = vadd.f32 %v3070_v37, %v2089_v35  ;;  %v2104_v40 = vadd.f32 %v2841_v36, %v3965_v43 }
 0x3ee   : > { %v2098_v41 = vpop.f32.mrf.mxu1 }
 0x3ef   : > { %2231 = vst [vmem:[%s3595_s16 + $0x1e0] sm:$0xff] %v2167_v38  ;;  %v2170_v44 = vadd.f32 %v3071_v42, %v2104_v40  ;;  %v2099_v10 = vadd.f32 %v3965_v43, %v2098_v41 }
 0x3f1   : > { %2234 = vst [vmem:[%s3595_s16 + $0x1f8] sm:$0xff] %v2170_v44  ;;  %v2169_v39 = vadd.f32 %v3072_v45, %v2099_v10 }
 0x3f3   : > { %2233 = vst [vmem:[%s3595_s16 + $0x1f0] sm:$0xff] %v2169_v39 }
 0x3f4 PF: > { %s4292_s7 = sld [smem:[#allocation20_spill]]  ;;  %s2249_s11 = sshll.u32 %s3595_s16, 4  ;;  %s4166_s11 = int_to_ptr.vmem [resolvable:$true] %s2249_s11 }
 0x3f5   : > { %s4293_s15 = sld [smem:[#allocation24_spill]]  ;;  %s2236_s21 = scalar_lea.sflag [#allocation6], %s3569_s9 }
 0x3f6   : > { %s4294_s5 = sld [smem:[#allocation32_spill]]  ;;  %s3181_s19 = scalar_lea.vmem %s4166_s11, 8192 }
 0x3f7   : > { %p3182_p7 = scmp.ne.s32.totalorder %s4166_s11, %s3181_s19  ;;  %s3324_s25 = smov [#allocation12]  }
 0x3f8   : > { %s3185_s18 = sshll.u32 %s3324_s25, 4  ;;  %s3186_s18 = int_to_ptr.vmem [resolvable:$false] %s3185_s18 }
 0x3f9   : > { %s3187_s24 = scalar_lea.vmem %s3186_s18, 16384  ;;  %p3188_p9 = scmp.lt.s32.totalorder %s4166_s11, %s3186_s18 }
 0x3fa   : > { %s2425_s4 = sshll.u32 %s4292_s7, 13  ;;  %p3189_p13 = scmp.lt.s32.totalorder %s3187_s24, %s3181_s19 }
 0x3fb   : > { %p4295_p10 = scmp.ne.s32.totalorder %s4293_s15, 0 }
 0x3fc   : > { %s4163_s8 = scalar_lea.hbm %s4294_s5, %s2425_s4  ;;  %p3190_p2 = por %p3189_p13, %p3188_p9 }
 0x3fd   : > { %p3183_p0 = pnand %p3182_p7, %p4295_p10 }
 0x3ff   : > { %p3184_p4 = pneg %p3183_p0 }
 0x401   : > { %p3191_p11 = pnand %p3190_p2, %p3184_p4 }
 0x403   : > { %3194 = shalt.err (!%p3191_p11)
}
 0x404   : > { %s3195_s16 = scalar_lea.hbm %s4163_s8, 8192  ;;  %s3199_s22 = scalar_lea.hbm %s4294_s5, 16384 }
 0x405   : > { %p3196_p6 = scmp.ne.s32.totalorder %s4163_s8, %s3195_s16  ;;  %p3200_p5 = scmp.lt.s32.totalorder %s4163_s8, %s4294_s5 }
 0x406   : > { %p3201_p12 = scmp.lt.s32.totalorder %s3199_s22, %s3195_s16 }
 0x407   : > { %p3197_p8 = pnand %p3196_p6, %p4295_p10 }
 0x408   : > { %p3202_p1 = por %p3201_p12, %p3200_p5 }
 0x409   : > { %p3198_p3 = pneg %p3197_p8 }
 0x40b   : > { %p3203_p7 = pnand %p3202_p1, %p3198_p3 }
 0x40d   : > { %3206 = shalt.err (!%p3203_p7)
}
 0x40e   : > { %s3325_s14 = smov 128   ;;  %s3326_s23 = smov 8  }
 0x40f   : > { %2886 = dma.vmem_to_hbm [thread:$0]  (%p4295_p10), %s4166_s11, 8192, %s4163_s8, %s2236_s21, %s3325_s14, %s3325_s14, %s3326_s23  }
 0x410 PF: > { %s4296_s3 = sld [smem:[#allocation18_spill]]  ;;  %p2911_p0 = scmp.ge.s32.totalorder %s3313_s12, 2 }
 0x411   : > { %s4297_s29 = sld [smem:[#allocation22_spill]] }
 0x416   : > { %s2264_s7 = sand.u32 1, %s4296_s3  }
 0x417   : > { %p4298_p4 = scmp.ne.s32.totalorder %s4297_s29, 0  ;;  %s2265_s4 = scalar_lea.sflag [#allocation6], %s2264_s7 }
 0x419   : > { %p2903_p9 = pnand %p2911_p0, %p4298_p4 }
 0x41b   : > { %p2904_p13 = pneg %p2903_p9 }
 0x41d   : > { %3268 = dma.done.wait (%p2904_p13), %s2265_s4, 8192  }
 0x41e   : > { %3270 = vsyncadd (%p2904_p13), %s2265_s4, 4294959104  ;;  %s28_s12 = sadd.s32 1, %s3313_s12   ;;  %s4299_s15 = smov %s3522_s26 }
 0x41f   : > { %p25_p2 = scmp.ge.s32.totalorder %s28_s12, 6   ;;  %s4300_s9 = sld [smem:[#allocation19_spill]] }
 0x420   : > { %s4301_s8 = sld [smem:[#allocation26_spill]]  ;;  %s4305_s26 = smov %s3277_s27 }
 0x421   : > { %s4302_s6 = sld [smem:[#allocation21_spill]]  ;;  %s4306_s27 = smov %s3281_s28 }
 0x422   : > { %s4303_s1 = sld [smem:[#allocation23_spill]]  ;;  %s4307_s28 = smov %s4299_s15 }
 0x423   : > { %s4304_s11 = sld [smem:[#allocation25_spill]]  ;;  %s4308_s29 = smov %s3289_s30 }
 0x424   : > { %s4310_s0 = smov %s3305_s10  ;;  %27 = sbr.rel (!%p25_p2) target bundleno = 20 (0x14), region = 124 }
 0x425   : > { %s4309_s30 = smov %s4300_s9 }
 0x427   : > { %s4311_s9 = smov %s4302_s6 }
 0x428   : > { %s4312_s10 = smov %s4303_s1 }
 0x429   :  { %2270 = vsyncpa [#allocation5], 1 }
 0x42a   :  { %2272 = vsyncpa [#allocation5 + $0x1], 1 }
 0x42b   :  { %2273 = vsyncpa [#allocation8], 1 }
 0x42c   :  { %2275 = vsyncpa [#allocation8 + $0x1], 1 }
 0x42d   :  { %2276 = vsyncpa [#allocation11], 1 }
 0x42e   :  { %2277 = vsyncpa [#allocation6], 1 }
 0x42f   :  { %2279 = vsyncpa [#allocation6 + $0x1], 1 }

</bundles_post_ra>
